<compile_context>
chip_gen: v7x
topology: tpu7x:2x2x1
jax: 0.10.0
libtpu: 0.0.40
codegen_flags: <defaults>
</compile_context>

<pallas_src>
import jax
import jax.numpy as jnp
from jax import lax
from jax.experimental import pallas as pl
from jax.experimental.pallas import tpu as pltpu


NEG_BIG = -1.0e30  # masks padded vocab columns out of log_softmax (exp -> 0)


def _round_up(x, m):
    return ((x + m - 1) // m) * m


def _vmem_limit_bytes(nbytes):
    """Scoped-VMEM limit: actual need + headroom, clamped to sane bounds."""
    return int(max(32 << 20, min(nbytes * 3 // 2 + (2 << 20), 128 << 20)))


def _resident_spec(shape):
    """Constant-index weight/bias block: fetched once, single-buffered."""
    return pl.BlockSpec(shape, lambda i: (0,) * len(shape),
                        pipeline_mode=pl.Buffered(1))


# ---------------------------------------------------------------------------
# Kernel 1: LSTM recurrence over one time tile.
#   Phase A: gates_x = x @ W_ih^T + (b_ih + b_hh) for the whole tile (bf16 MXU,
#            f32 accumulation; bias broadcast hoisted out of the loop).
#   Phase B: serial recurrence, only h @ W_hh^T inside the (fully unrolled) loop.
# h/c live in f32 VMEM scratch and persist across grid steps (time axis
# "arbitrary"); h is written batch-first in bf16.
# ---------------------------------------------------------------------------
def lstm_recurrence_kernel(emb_ref, w_ih_ref, w_hh_ref, b_ref,
                           h_out_ref, h_sc, c_sc, gx_sc):
    tT = gx_sc.shape[0]
    Bp, Hp = h_sc.shape

    @pl.when(pl.program_id(0) == 0)
    def _():
        h_sc[...] = jnp.zeros_like(h_sc)
        c_sc[...] = jnp.zeros_like(c_sc)

    # Phase A: input-to-hidden matmul for all timesteps of the tile at once.
    # emb_ref is pre-flattened to (tT*Bp, E) bf16 rows by the wrapper.
    gx2 = jnp.dot(emb_ref[...], w_ih_ref[...],
                  preferred_element_type=jnp.float32) + b_ref[...]
    gx_sc[...] = gx2.reshape(tT, Bp, 4 * Hp)

    # Phase B: the serial part of the recurrence.
    def step(t, carry):
        gates = gx_sc[t] + jnp.dot(h_sc[...].astype(jnp.bfloat16), w_hh_ref[...],
                                   preferred_element_type=jnp.float32)
        # PyTorch gate order: input, forget, cell(g), output.
        # Hp is a multiple of 128 -> slices are lane-aligned (no relayout).
        i_g = jax.nn.sigmoid(gates[:, 0 * Hp:1 * Hp])
        f_g = jax.nn.sigmoid(gates[:, 1 * Hp:2 * Hp])
        g_g = jnp.tanh(gates[:, 2 * Hp:3 * Hp])
        o_g = jax.nn.sigmoid(gates[:, 3 * Hp:4 * Hp])

        c_new = f_g * c_sc[...] + i_g * g_g
        h_new = o_g * jnp.tanh(c_new)
        c_sc[...] = c_new
        h_sc[...] = h_new
        # Batch-first bf16 store: halves the inter-kernel HBM round trip and
        # lets kernel 2 consume rows without any transpose.
        h_out_ref[:, t, :] = h_new.astype(h_out_ref.dtype)
        return carry

    # Full unroll: tT is small/fixed; gives the LLO scheduler visibility to
    # overlap gx loads, gate slicing and EUP sigmoid/tanh with the MXU work.
    lax.fori_loop(0, tT, step, 0, unroll=True)


# ---------------------------------------------------------------------------
# Kernel 2: output projection + log_softmax for one tile of flattened
# (batch*time) rows; bf16 operands, f32 accumulation and softmax math.
# ---------------------------------------------------------------------------
def projection_logsoftmax_kernel(h_ref, w_out_ref, b_out_ref, out_ref):
    logits = jnp.dot(h_ref[...], w_out_ref[...],
                     preferred_element_type=jnp.float32) + b_out_ref[...]
    m = jnp.max(logits, axis=-1, keepdims=True)
    shifted = logits - m
    lse = jnp.log(jnp.sum(jnp.exp(shifted), axis=-1, keepdims=True))
    out_ref[...] = shifted - lse
    # TODO(synk): for very large vocabularies (v7x 64 MiB VMEM) add a vocab-tile
    # grid axis streaming (Hp, tV) slices of W_out^T with a two-pass / online
    # log_softmax instead of keeping the whole weight resident.


def rnn_lm_forward(inputs, params, *, time_tile_rec=32, proj_row_tile=256):
    """inputs: (B, T) int32 token ids. Returns (B, T, V) float32 log-probs.

    time_tile_rec: timesteps per LSTM grid step (Phase-A matmul gets tT*Bp rows;
      32 -> 256 rows fills a v6e/v7x MXU pass, use 16 on v5e).
    proj_row_tile: flattened (B*T) rows per projection grid step (256 for
      v6e/v7x, 128 for v5e).
    """
    emb_w = params["emb"]      # (V, E)
    w_ih = params["w_ih"]      # (4H, E)  torch layout
    w_hh = params["w_hh"]      # (4H, H)
    b_ih = params["b_ih"]      # (4H,)
    b_hh = params["b_hh"]      # (4H,)
    w_lin = params["w_lin"]    # (V, H)
    b_lin = params["b_lin"]    # (V,)

    B, T = inputs.shape
    V, E = emb_w.shape
    H = w_hh.shape[1]

    # TPU-friendly padding: batch -> sublane multiple, hidden/vocab -> lane mult.
    Bp = _round_up(B, 8)
    Hp = _round_up(H, 128)
    Vp = _round_up(V, 128)

    # --- pad parameters (per-gate padding for the LSTM weights) -------------
    w_ih_p = jnp.zeros((4, Hp, E), jnp.float32).at[:, :H, :].set(
        w_ih.reshape(4, H, E)).reshape(4 * Hp, E)
    w_hh_p = jnp.zeros((4, Hp, Hp), jnp.float32).at[:, :H, :H].set(
        w_hh.reshape(4, H, H)).reshape(4 * Hp, Hp)
    bias_p = jnp.zeros((4, Hp), jnp.float32).at[:, :H].set(
        (b_ih + b_hh).reshape(4, H)).reshape(1, 4 * Hp)
    w_lin_p = jnp.zeros((Vp, Hp), jnp.float32).at[:V, :H].set(w_lin)
    b_lin_p = jnp.full((Vp,), NEG_BIG, jnp.float32).at[:V].set(b_lin).reshape(1, Vp)

    # bf16 MXU copies (f32 accumulation happens inside the kernels).
    w_ih_t = jnp.transpose(w_ih_p).astype(jnp.bfloat16)     # (E, 4Hp)
    w_hh_t = jnp.transpose(w_hh_p).astype(jnp.bfloat16)     # (Hp, 4Hp)
    w_lin_t = jnp.transpose(w_lin_p).astype(jnp.bfloat16)   # (Hp, Vp)

    # --- time tiling: pad T up to a multiple of the tile (never collapse grid)
    tT = _round_up(min(time_tile_rec, _round_up(T, 8)), 8)
    Tp = _round_up(T, tT)

    # --- time-major, batch/time-padded embedding gather (bf16 activations);
    #     pre-flattened to (Tp*Bp, E) rows so kernel 1 needs no input reshape.
    ids_tm = jnp.zeros((Tp, Bp), jnp.int32).at[:T, :B].set(jnp.transpose(inputs))
    embeds_rows = jnp.take(emb_w, ids_tm, axis=0).astype(
        jnp.bfloat16).reshape(Tp * Bp, E)

    # --- phase 1: LSTM recurrence, grid-pipelined over time -----------------
    k1_vmem = (2 * tT * Bp * E * 2          # embedding tile (bf16, double-buffered)
               + E * 4 * Hp * 2             # W_ih^T  (bf16, single-buffered)
               + Hp * 4 * Hp * 2            # W_hh^T  (bf16, single-buffered)
               + 4 * Hp * 4                 # fused bias (f32, single-buffered)
               + 2 * Bp * tT * Hp * 2       # h output tile (bf16, double-buffered)
               + 2 * Bp * Hp * 4            # h/c state scratch
               + tT * Bp * 4 * Hp * 4)      # gates_x scratch

    h_all = pl.pallas_call(
        lstm_recurrence_kernel,
        out_shape=jax.ShapeDtypeStruct((Bp, Tp, Hp), jnp.bfloat16),
        grid_spec=pltpu.PrefetchScalarGridSpec(
            num_scalar_prefetch=0,
            grid=(Tp // tT,),
            in_specs=[
                pl.BlockSpec((tT * Bp, E), lambda i: (i, 0)),
                _resident_spec((E, 4 * Hp)),
                _resident_spec((Hp, 4 * Hp)),
                _resident_spec((1, 4 * Hp)),
            ],
            out_specs=pl.BlockSpec((Bp, tT, Hp), lambda i: (0, i, 0)),
            scratch_shapes=[
                pltpu.VMEM((Bp, Hp), jnp.float32),          # h state (carried)
                pltpu.VMEM((Bp, Hp), jnp.float32),          # c state (carried)
                pltpu.VMEM((tT, Bp, 4 * Hp), jnp.float32),  # gates_x tile
            ],
        ),
        compiler_params=pltpu.CompilerParams(
            dimension_semantics=("arbitrary",),
            vmem_limit_bytes=_vmem_limit_bytes(k1_vmem)),
    )(embeds_rows, w_ih_t, w_hh_t, bias_p)
    # TODO(synk): when B >= 16 (v7x, 2 TensorCores) add a leading batch grid axis
    # over Bp=8 blocks with dimension_semantics=("parallel", "arbitrary").

    # --- phase 2: projection + log_softmax over flattened real (B*T) rows ---
    rows = B * T
    rt = _round_up(min(proj_row_tile, _round_up(rows, 8)), 8)
    n_rows = _round_up(rows, rt)
    h_rows = h_all[:B, :T, :].reshape(rows, Hp)   # drop padded batch/time rows
    if n_rows > rows:
        h_rows = jnp.pad(h_rows, ((0, n_rows - rows), (0, 0)))

    k2_vmem = (2 * rt * Hp * 2            # h rows tile (bf16, double-buffered)
               + Hp * Vp * 2              # W_out^T (bf16, single-buffered)
               + Vp * 4                   # bias + vocab-pad mask (f32)
               + 2 * rt * Vp * 4)         # log-prob tile (f32, double-buffered)

    out_p = pl.pallas_call(
        projection_logsoftmax_kernel,
        out_shape=jax.ShapeDtypeStruct((n_rows, Vp), jnp.float32),
        grid_spec=pltpu.PrefetchScalarGridSpec(
            num_scalar_prefetch=0,
            grid=(n_rows // rt,),
            in_specs=[
                pl.BlockSpec((rt, Hp), lambda i: (i, 0)),
                _resident_spec((Hp, Vp)),
                _resident_spec((1, Vp)),
            ],
            out_specs=pl.BlockSpec((rt, Vp), lambda i: (i, 0)),
        ),
        compiler_params=pltpu.CompilerParams(
            dimension_semantics=("parallel",),
            vmem_limit_bytes=_vmem_limit_bytes(k2_vmem)),
    )(h_rows, w_lin_t, b_lin_p)

    return out_p[:rows, :V].reshape(B, T, V)


def rnn_lm_reference(inputs, params):
    """Pure-JAX f32 reference replicating torch semantics."""
    emb_w = params["emb"]
    w_ih, w_hh = params["w_ih"], params["w_hh"]
    b_ih, b_hh = params["b_ih"], params["b_hh"]
    w_lin, b_lin = params["w_lin"], params["b_lin"]
    H = w_hh.shape[1]
    B = inputs.shape[0]

    embeds = jnp.take(emb_w, inputs, axis=0)           # (B, T, E)
    x_tm = jnp.transpose(embeds, (1, 0, 2))            # (T, B, E)

    def step(carry, x_t):
        h, c = carry
        gates = x_t @ w_ih.T + b_ih + h @ w_hh.T + b_hh
        i_g = jax.nn.sigmoid(gates[:, 0 * H:1 * H])
        f_g = jax.nn.sigmoid(gates[:, 1 * H:2 * H])
        g_g = jnp.tanh(gates[:, 2 * H:3 * H])
        o_g = jax.nn.sigmoid(gates[:, 3 * H:4 * H])
        c_new = f_g * c + i_g * g_g
        h_new = o_g * jnp.tanh(c_new)
        return (h_new, c_new), h_new

    h0 = jnp.zeros((B, H), jnp.float32)
    c0 = jnp.zeros((B, H), jnp.float32)
    _, hs = lax.scan(step, (h0, c0), x_tm)             # (T, B, H)
    hs = jnp.transpose(hs, (1, 0, 2))                  # (B, T, H)
    logits = hs @ w_lin.T + b_lin
    return jax.nn.log_softmax(logits, axis=2)


def init_params(key, vocab_size, embedding_dim, hidden_dim):
    ks = jax.random.split(key, 7)
    lstm_bound = 1.0 / jnp.sqrt(hidden_dim)
    lin_bound = 1.0 / jnp.sqrt(hidden_dim)
    u = lambda k, shape, b: jax.random.uniform(k, shape, jnp.float32, -b, b)
    return {
        "emb":   jax.random.normal(ks[0], (vocab_size, embedding_dim), jnp.float32),
        "w_ih":  u(ks[1], (4 * hidden_dim, embedding_dim), lstm_bound),
        "w_hh":  u(ks[2], (4 * hidden_dim, hidden_dim), lstm_bound),
        "b_ih":  u(ks[3], (4 * hidden_dim,), lstm_bound),
        "b_hh":  u(ks[4], (4 * hidden_dim,), lstm_bound),
        "w_lin": u(ks[5], (vocab_size, hidden_dim), lin_bound),
        "b_lin": u(ks[6], (vocab_size,), lin_bound),
    }


if __name__ == "__main__":
    vocab_size, embedding_dim, hidden_dim = 32, 16, 32
    batch, seq = 2, 16   # seq=16, time tile 8 -> 2-step recurrence grid (carry exercised)

    key = jax.random.PRNGKey(0)
    k_params, k_inputs, k_inputs2 = jax.random.split(key, 3)
    params = init_params(k_params, vocab_size, embedding_dim, hidden_dim)
    inputs = jax.random.randint(k_inputs, (batch, seq), 0, vocab_size,
                                dtype=jnp.int32)

    out = jax.block_until_ready(
        rnn_lm_forward(inputs, params, time_tile_rec=8, proj_row_tile=16))
    ref = jax.block_until_ready(rnn_lm_reference(inputs, params))

    assert out.shape == (batch, seq, vocab_size), out.shape
    # bf16 MXU operands (f32 accumulation) vs the pure-f32 reference.
    assert jnp.allclose(out, ref, atol=5e-2, rtol=1e-2), \
        float(jnp.max(jnp.abs(out - ref)))
    # log-probs should normalize: exp(out) sums to ~1 over vocab.
    assert jnp.allclose(jnp.sum(jnp.exp(out), axis=2), 1.0, atol=1e-3)

    # Non-divisible T and B<Bp exercise the time/row padding paths.
    inputs2 = jax.random.randint(k_inputs2, (3, 11), 0, vocab_size,
                                 dtype=jnp.int32)
    out2 = jax.block_until_ready(
        rnn_lm_forward(inputs2, params, time_tile_rec=8, proj_row_tile=16))
    ref2 = jax.block_until_ready(rnn_lm_reference(inputs2, params))
    assert out2.shape == (3, 11, vocab_size), out2.shape
    assert jnp.allclose(out2, ref2, atol=5e-2, rtol=1e-2), \
        float(jnp.max(jnp.abs(out2 - ref2)))

    print("KERNEL_OK")
</pallas_src>

<mosaic_0001>
module attributes {stable_mosaic.version = 11 : i64} {
  func.func @lstm_recurrence_kernel(%arg0: i32, %arg1: memref<64x16xbf16, #tpu.memory_space<vmem>>, %arg2: memref<16x512xbf16, #tpu.memory_space<vmem>>, %arg3: memref<128x512xbf16, #tpu.memory_space<vmem>>, %arg4: memref<1x512xf32, #tpu.memory_space<vmem>>, %arg5: memref<8x8x128xbf16, #tpu.memory_space<vmem>>, %arg6: memref<8x128xf32, #tpu.memory_space<vmem>>, %arg7: memref<8x128xf32, #tpu.memory_space<vmem>>, %arg8: memref<8x8x512xf32, #tpu.memory_space<vmem>>) attributes {dimension_semantics = [#tpu.dimension_semantics<arbitrary>], iteration_bounds = array<i64: 2>, scalar_prefetch = 0 : i64, scratch_operands = 3 : i64, tpu.core_type = #tpu.core_type<tc>, window_params = [{transform_indices = @transform_0, window_bounds = array<i64: 64, 16>}, {pipeline_mode = #tpu.pipeline_mode<synchronous>, transform_indices = @transform_1, window_bounds = array<i64: 16, 512>}, {pipeline_mode = #tpu.pipeline_mode<synchronous>, transform_indices = @transform_2, window_bounds = array<i64: 128, 512>}, {pipeline_mode = #tpu.pipeline_mode<synchronous>, transform_indices = @transform_3, window_bounds = array<i64: 1, 512>}, {transform_indices = @transform_4, window_bounds = array<i64: 8, 8, 128>}]} {
    %c0_i32 = arith.constant 0 : i32
    %0 = arith.cmpi eq, %arg0, %c0_i32 : i32
    %1 = arith.extui %0 : i1 to i32
    %c0_i32_0 = arith.constant 0 : i32
    %2 = arith.cmpi ne, %1, %c0_i32_0 : i32
    scf.if %2 {
      %cst_154 = arith.constant 0.000000e+00 : f32
      %339 = vector.broadcast %cst_154 : f32 to vector<8x128xf32>
      %c0_155 = arith.constant 0 : index
      %c0_156 = arith.constant 0 : index
      %340 = vector.load %arg6[%c0_155, %c0_156] : memref<8x128xf32, #tpu.memory_space<vmem>>, vector<8x128xf32>
      tpu.vector_store %arg6[%c0_155, %c0_156], %339 {strides = array<i32>} : memref<8x128xf32, #tpu.memory_space<vmem>>, vector<8x128xf32>,
      %cst_157 = arith.constant 0.000000e+00 : f32
      %341 = vector.broadcast %cst_157 : f32 to vector<8x128xf32>
      %c0_158 = arith.constant 0 : index
      %c0_159 = arith.constant 0 : index
      %342 = vector.load %arg7[%c0_158, %c0_159] : memref<8x128xf32, #tpu.memory_space<vmem>>, vector<8x128xf32>
      tpu.vector_store %arg7[%c0_158, %c0_159], %341 {strides = array<i32>} : memref<8x128xf32, #tpu.memory_space<vmem>>, vector<8x128xf32>,
    } else {
    }
    %c0 = arith.constant 0 : index
    %c0_1 = arith.constant 0 : index
    %3 = vector.load %arg1[%c0, %c0_1] : memref<64x16xbf16, #tpu.memory_space<vmem>>, vector<64x16xbf16>
    %c0_2 = arith.constant 0 : index
    %c0_3 = arith.constant 0 : index
    %4 = vector.load %arg2[%c0_2, %c0_3] : memref<16x512xbf16, #tpu.memory_space<vmem>>, vector<16x512xbf16>
    %cst = arith.constant dense<0.000000e+00> : vector<64x512xf32>
    %5 = tpu.matmul %3, %4, %cst {dimension_numbers = #tpu.dot_dimension_numbers<[1], [0], [0], [1], [0, 0, 1, 1], [], []>} : vector<64x16xbf16>, vector<16x512xbf16>, vector<64x512xf32> -> vector<64x512xf32>
    %c0_4 = arith.constant 0 : index
    %c0_5 = arith.constant 0 : index
    %6 = vector.load %arg4[%c0_4, %c0_5] : memref<1x512xf32, #tpu.memory_space<vmem>>, vector<1x512xf32>
    %7 = vector.broadcast %6 : vector<1x512xf32> to vector<64x512xf32>
    %8 = arith.addf %5, %7 : vector<64x512xf32>
    %9 = vector.shape_cast %8 : vector<64x512xf32> to vector<8x8x512xf32>
    %c0_6 = arith.constant 0 : index
    %c0_7 = arith.constant 0 : index
    %c0_8 = arith.constant 0 : index
    %10 = vector.load %arg8[%c0_6, %c0_7, %c0_8] : memref<8x8x512xf32, #tpu.memory_space<vmem>>, vector<8x8x512xf32>
    tpu.vector_store %arg8[%c0_6, %c0_7, %c0_8], %9 {strides = array<i32>} : memref<8x8x512xf32, #tpu.memory_space<vmem>>, vector<8x8x512xf32>,
    %c0_i32_9 = arith.constant 0 : i32
    %11 = arith.index_cast %c0_i32_9 : i32 to index
    %c0_10 = arith.constant 0 : index
    %c0_11 = arith.constant 0 : index
    %12 = vector.load %arg8[%11, %c0_10, %c0_11] : memref<8x8x512xf32, #tpu.memory_space<vmem>>, vector<1x8x512xf32>
    %13 = vector.shape_cast %12 : vector<1x8x512xf32> to vector<8x512xf32>
    %c0_12 = arith.constant 0 : index
    %c0_13 = arith.constant 0 : index
    %14 = vector.load %arg6[%c0_12, %c0_13] : memref<8x128xf32, #tpu.memory_space<vmem>>, vector<8x128xf32>
    %15 = arith.truncf %14 : vector<8x128xf32> to vector<8x128xbf16>
    %c0_14 = arith.constant 0 : index
    %c0_15 = arith.constant 0 : index
    %16 = vector.load %arg3[%c0_14, %c0_15] : memref<128x512xbf16, #tpu.memory_space<vmem>>, vector<128x512xbf16>
    %cst_16 = arith.constant dense<0.000000e+00> : vector<8x512xf32>
    %17 = tpu.matmul %15, %16, %cst_16 {dimension_numbers = #tpu.dot_dimension_numbers<[1], [0], [0], [1], [0, 0, 1, 1], [], []>} : vector<8x128xbf16>, vector<128x512xbf16>, vector<8x512xf32> -> vector<8x512xf32>
    %18 = arith.addf %13, %17 : vector<8x512xf32>
    %19 = vector.extract_strided_slice %18 {offsets = [0, 0], sizes = [8, 128], strides = [1, 1]} : vector<8x512xf32> to vector<8x128xf32>
    %20 = arith.negf %19 : vector<8x128xf32>
    %21 = math.exp %20 : vector<8x128xf32>
    %cst_17 = arith.constant 1.000000e+00 : f32
    %22 = vector.broadcast %cst_17 : f32 to vector<8x128xf32>
    %23 = arith.addf %22, %21 : vector<8x128xf32>
    %24 = arith.divf %22, %23 : vector<8x128xf32>
    %25 = vector.extract_strided_slice %18 {offsets = [0, 128], sizes = [8, 128], strides = [1, 1]} : vector<8x512xf32> to vector<8x128xf32>
    %26 = arith.negf %25 : vector<8x128xf32>
    %27 = math.exp %26 : vector<8x128xf32>
    %cst_18 = arith.constant 1.000000e+00 : f32
    %28 = vector.broadcast %cst_18 : f32 to vector<8x128xf32>
    %29 = arith.addf %28, %27 : vector<8x128xf32>
    %30 = arith.divf %28, %29 : vector<8x128xf32>
    %31 = vector.extract_strided_slice %18 {offsets = [0, 256], sizes = [8, 128], strides = [1, 1]} : vector<8x512xf32> to vector<8x128xf32>
    %32 = math.tanh %31 : vector<8x128xf32>
    %33 = vector.extract_strided_slice %18 {offsets = [0, 384], sizes = [8, 128], strides = [1, 1]} : vector<8x512xf32> to vector<8x128xf32>
    %34 = arith.negf %33 : vector<8x128xf32>
    %35 = math.exp %34 : vector<8x128xf32>
    %cst_19 = arith.constant 1.000000e+00 : f32
    %36 = vector.broadcast %cst_19 : f32 to vector<8x128xf32>
    %37 = arith.addf %36, %35 : vector<8x128xf32>
    %38 = arith.divf %36, %37 : vector<8x128xf32>
    %c0_20 = arith.constant 0 : index
    %c0_21 = arith.constant 0 : index
    %39 = vector.load %arg7[%c0_20, %c0_21] : memref<8x128xf32, #tpu.memory_space<vmem>>, vector<8x128xf32>
    %40 = arith.mulf %30, %39 : vector<8x128xf32>
    %41 = arith.mulf %24, %32 : vector<8x128xf32>
    %42 = arith.addf %40, %41 : vector<8x128xf32>
    %43 = math.tanh %42 : vector<8x128xf32>
    %44 = arith.mulf %38, %43 : vector<8x128xf32>
    %c0_22 = arith.constant 0 : index
    %c0_23 = arith.constant 0 : index
    %45 = vector.load %arg7[%c0_22, %c0_23] : memref<8x128xf32, #tpu.memory_space<vmem>>, vector<8x128xf32>
    tpu.vector_store %arg7[%c0_22, %c0_23], %42 {strides = array<i32>} : memref<8x128xf32, #tpu.memory_space<vmem>>, vector<8x128xf32>,
    %c0_24 = arith.constant 0 : index
    %c0_25 = arith.constant 0 : index
    %46 = vector.load %arg6[%c0_24, %c0_25] : memref<8x128xf32, #tpu.memory_space<vmem>>, vector<8x128xf32>
    tpu.vector_store %arg6[%c0_24, %c0_25], %44 {strides = array<i32>} : memref<8x128xf32, #tpu.memory_space<vmem>>, vector<8x128xf32>,
    %47 = arith.truncf %44 : vector<8x128xf32> to vector<8x128xbf16>
    %c0_26 = arith.constant 0 : index
    %48 = arith.index_cast %c0_i32_9 : i32 to index
    %c0_27 = arith.constant 0 : index
    %49 = vector.load %arg5[%c0_26, %48, %c0_27] : memref<8x8x128xbf16, #tpu.memory_space<vmem>>, vector<8x1x128xbf16>
    %50 = vector.shape_cast %49 : vector<8x1x128xbf16> to vector<8x128xbf16>
    %51 = vector.shape_cast %47 : vector<8x128xbf16> to vector<8x1x128xbf16>
    tpu.vector_store %arg5[%c0_26, %48, %c0_27], %51 {strides = array<i32>} : memref<8x8x128xbf16, #tpu.memory_space<vmem>>, vector<8x1x128xbf16>,
    %c1_i32 = arith.constant 1 : i32
    %52 = arith.index_cast %c1_i32 : i32 to index
    %c0_28 = arith.constant 0 : index
    %c0_29 = arith.constant 0 : index
    %53 = vector.load %arg8[%52, %c0_28, %c0_29] : memref<8x8x512xf32, #tpu.memory_space<vmem>>, vector<1x8x512xf32>
    %54 = vector.shape_cast %53 : vector<1x8x512xf32> to vector<8x512xf32>
    %c0_30 = arith.constant 0 : index
    %c0_31 = arith.constant 0 : index
    %55 = vector.load %arg6[%c0_30, %c0_31] : memref<8x128xf32, #tpu.memory_space<vmem>>, vector<8x128xf32>
    %56 = arith.truncf %55 : vector<8x128xf32> to vector<8x128xbf16>
    %c0_32 = arith.constant 0 : index
    %c0_33 = arith.constant 0 : index
    %57 = vector.load %arg3[%c0_32, %c0_33] : memref<128x512xbf16, #tpu.memory_space<vmem>>, vector<128x512xbf16>
    %cst_34 = arith.constant dense<0.000000e+00> : vector<8x512xf32>
    %58 = tpu.matmul %56, %57, %cst_34 {dimension_numbers = #tpu.dot_dimension_numbers<[1], [0], [0], [1], [0, 0, 1, 1], [], []>} : vector<8x128xbf16>, vector<128x512xbf16>, vector<8x512xf32> -> vector<8x512xf32>
    %59 = arith.addf %54, %58 : vector<8x512xf32>
    %60 = vector.extract_strided_slice %59 {offsets = [0, 0], sizes = [8, 128], strides = [1, 1]} : vector<8x512xf32> to vector<8x128xf32>
    %61 = arith.negf %60 : vector<8x128xf32>
    %62 = math.exp %61 : vector<8x128xf32>
    %cst_35 = arith.constant 1.000000e+00 : f32
    %63 = vector.broadcast %cst_35 : f32 to vector<8x128xf32>
    %64 = arith.addf %63, %62 : vector<8x128xf32>
    %65 = arith.divf %63, %64 : vector<8x128xf32>
    %66 = vector.extract_strided_slice %59 {offsets = [0, 128], sizes = [8, 128], strides = [1, 1]} : vector<8x512xf32> to vector<8x128xf32>
    %67 = arith.negf %66 : vector<8x128xf32>
    %68 = math.exp %67 : vector<8x128xf32>
    %cst_36 = arith.constant 1.000000e+00 : f32
    %69 = vector.broadcast %cst_36 : f32 to vector<8x128xf32>
    %70 = arith.addf %69, %68 : vector<8x128xf32>
    %71 = arith.divf %69, %70 : vector<8x128xf32>
    %72 = vector.extract_strided_slice %59 {offsets = [0, 256], sizes = [8, 128], strides = [1, 1]} : vector<8x512xf32> to vector<8x128xf32>
    %73 = math.tanh %72 : vector<8x128xf32>
    %74 = vector.extract_strided_slice %59 {offsets = [0, 384], sizes = [8, 128], strides = [1, 1]} : vector<8x512xf32> to vector<8x128xf32>
    %75 = arith.negf %74 : vector<8x128xf32>
    %76 = math.exp %75 : vector<8x128xf32>
    %cst_37 = arith.constant 1.000000e+00 : f32
    %77 = vector.broadcast %cst_37 : f32 to vector<8x128xf32>
    %78 = arith.addf %77, %76 : vector<8x128xf32>
    %79 = arith.divf %77, %78 : vector<8x128xf32>
    %c0_38 = arith.constant 0 : index
    %c0_39 = arith.constant 0 : index
    %80 = vector.load %arg7[%c0_38, %c0_39] : memref<8x128xf32, #tpu.memory_space<vmem>>, vector<8x128xf32>
    %81 = arith.mulf %71, %80 : vector<8x128xf32>
    %82 = arith.mulf %65, %73 : vector<8x128xf32>
    %83 = arith.addf %81, %82 : vector<8x128xf32>
    %84 = math.tanh %83 : vector<8x128xf32>
    %85 = arith.mulf %79, %84 : vector<8x128xf32>
    %c0_40 = arith.constant 0 : index
    %c0_41 = arith.constant 0 : index
    %86 = vector.load %arg7[%c0_40, %c0_41] : memref<8x128xf32, #tpu.memory_space<vmem>>, vector<8x128xf32>
    tpu.vector_store %arg7[%c0_40, %c0_41], %83 {strides = array<i32>} : memref<8x128xf32, #tpu.memory_space<vmem>>, vector<8x128xf32>,
    %c0_42 = arith.constant 0 : index
    %c0_43 = arith.constant 0 : index
    %87 = vector.load %arg6[%c0_42, %c0_43] : memref<8x128xf32, #tpu.memory_space<vmem>>, vector<8x128xf32>
    tpu.vector_store %arg6[%c0_42, %c0_43], %85 {strides = array<i32>} : memref<8x128xf32, #tpu.memory_space<vmem>>, vector<8x128xf32>,
    %88 = arith.truncf %85 : vector<8x128xf32> to vector<8x128xbf16>
    %c0_44 = arith.constant 0 : index
    %89 = arith.index_cast %c1_i32 : i32 to index
    %c0_45 = arith.constant 0 : index
    %90 = vector.load %arg5[%c0_44, %89, %c0_45] : memref<8x8x128xbf16, #tpu.memory_space<vmem>>, vector<8x1x128xbf16>
    %91 = vector.shape_cast %90 : vector<8x1x128xbf16> to vector<8x128xbf16>
    %92 = vector.shape_cast %88 : vector<8x128xbf16> to vector<8x1x128xbf16>
    tpu.vector_store %arg5[%c0_44, %89, %c0_45], %92 {strides = array<i32>} : memref<8x8x128xbf16, #tpu.memory_space<vmem>>, vector<8x1x128xbf16>,
    %c2_i32 = arith.constant 2 : i32
    %93 = arith.index_cast %c2_i32 : i32 to index
    %c0_46 = arith.constant 0 : index
    %c0_47 = arith.constant 0 : index
    %94 = vector.load %arg8[%93, %c0_46, %c0_47] : memref<8x8x512xf32, #tpu.memory_space<vmem>>, vector<1x8x512xf32>
    %95 = vector.shape_cast %94 : vector<1x8x512xf32> to vector<8x512xf32>
    %c0_48 = arith.constant 0 : index
    %c0_49 = arith.constant 0 : index
    %96 = vector.load %arg6[%c0_48, %c0_49] : memref<8x128xf32, #tpu.memory_space<vmem>>, vector<8x128xf32>
    %97 = arith.truncf %96 : vector<8x128xf32> to vector<8x128xbf16>
    %c0_50 = arith.constant 0 : index
    %c0_51 = arith.constant 0 : index
    %98 = vector.load %arg3[%c0_50, %c0_51] : memref<128x512xbf16, #tpu.memory_space<vmem>>, vector<128x512xbf16>
    %cst_52 = arith.constant dense<0.000000e+00> : vector<8x512xf32>
    %99 = tpu.matmul %97, %98, %cst_52 {dimension_numbers = #tpu.dot_dimension_numbers<[1], [0], [0], [1], [0, 0, 1, 1], [], []>} : vector<8x128xbf16>, vector<128x512xbf16>, vector<8x512xf32> -> vector<8x512xf32>
    %100 = arith.addf %95, %99 : vector<8x512xf32>
    %101 = vector.extract_strided_slice %100 {offsets = [0, 0], sizes = [8, 128], strides = [1, 1]} : vector<8x512xf32> to vector<8x128xf32>
    %102 = arith.negf %101 : vector<8x128xf32>
    %103 = math.exp %102 : vector<8x128xf32>
    %cst_53 = arith.constant 1.000000e+00 : f32
    %104 = vector.broadcast %cst_53 : f32 to vector<8x128xf32>
    %105 = arith.addf %104, %103 : vector<8x128xf32>
    %106 = arith.divf %104, %105 : vector<8x128xf32>
    %107 = vector.extract_strided_slice %100 {offsets = [0, 128], sizes = [8, 128], strides = [1, 1]} : vector<8x512xf32> to vector<8x128xf32>
    %108 = arith.negf %107 : vector<8x128xf32>
    %109 = math.exp %108 : vector<8x128xf32>
    %cst_54 = arith.constant 1.000000e+00 : f32
    %110 = vector.broadcast %cst_54 : f32 to vector<8x128xf32>
    %111 = arith.addf %110, %109 : vector<8x128xf32>
    %112 = arith.divf %110, %111 : vector<8x128xf32>
    %113 = vector.extract_strided_slice %100 {offsets = [0, 256], sizes = [8, 128], strides = [1, 1]} : vector<8x512xf32> to vector<8x128xf32>
    %114 = math.tanh %113 : vector<8x128xf32>
    %115 = vector.extract_strided_slice %100 {offsets = [0, 384], sizes = [8, 128], strides = [1, 1]} : vector<8x512xf32> to vector<8x128xf32>
    %116 = arith.negf %115 : vector<8x128xf32>
    %117 = math.exp %116 : vector<8x128xf32>
    %cst_55 = arith.constant 1.000000e+00 : f32
    %118 = vector.broadcast %cst_55 : f32 to vector<8x128xf32>
    %119 = arith.addf %118, %117 : vector<8x128xf32>
    %120 = arith.divf %118, %119 : vector<8x128xf32>
    %c0_56 = arith.constant 0 : index
    %c0_57 = arith.constant 0 : index
    %121 = vector.load %arg7[%c0_56, %c0_57] : memref<8x128xf32, #tpu.memory_space<vmem>>, vector<8x128xf32>
    %122 = arith.mulf %112, %121 : vector<8x128xf32>
    %123 = arith.mulf %106, %114 : vector<8x128xf32>
    %124 = arith.addf %122, %123 : vector<8x128xf32>
    %125 = math.tanh %124 : vector<8x128xf32>
    %126 = arith.mulf %120, %125 : vector<8x128xf32>
    %c0_58 = arith.constant 0 : index
    %c0_59 = arith.constant 0 : index
    %127 = vector.load %arg7[%c0_58, %c0_59] : memref<8x128xf32, #tpu.memory_space<vmem>>, vector<8x128xf32>
    tpu.vector_store %arg7[%c0_58, %c0_59], %124 {strides = array<i32>} : memref<8x128xf32, #tpu.memory_space<vmem>>, vector<8x128xf32>,
    %c0_60 = arith.constant 0 : index
    %c0_61 = arith.constant 0 : index
    %128 = vector.load %arg6[%c0_60, %c0_61] : memref<8x128xf32, #tpu.memory_space<vmem>>, vector<8x128xf32>
    tpu.vector_store %arg6[%c0_60, %c0_61], %126 {strides = array<i32>} : memref<8x128xf32, #tpu.memory_space<vmem>>, vector<8x128xf32>,
    %129 = arith.truncf %126 : vector<8x128xf32> to vector<8x128xbf16>
    %c0_62 = arith.constant 0 : index
    %130 = arith.index_cast %c2_i32 : i32 to index
    %c0_63 = arith.constant 0 : index
    %131 = vector.load %arg5[%c0_62, %130, %c0_63] : memref<8x8x128xbf16, #tpu.memory_space<vmem>>, vector<8x1x128xbf16>
    %132 = vector.shape_cast %131 : vector<8x1x128xbf16> to vector<8x128xbf16>
    %133 = vector.shape_cast %129 : vector<8x128xbf16> to vector<8x1x128xbf16>
    tpu.vector_store %arg5[%c0_62, %130, %c0_63], %133 {strides = array<i32>} : memref<8x8x128xbf16, #tpu.memory_space<vmem>>, vector<8x1x128xbf16>,
    %c3_i32 = arith.constant 3 : i32
    %134 = arith.index_cast %c3_i32 : i32 to index
    %c0_64 = arith.constant 0 : index
    %c0_65 = arith.constant 0 : index
    %135 = vector.load %arg8[%134, %c0_64, %c0_65] : memref<8x8x512xf32, #tpu.memory_space<vmem>>, vector<1x8x512xf32>
    %136 = vector.shape_cast %135 : vector<1x8x512xf32> to vector<8x512xf32>
    %c0_66 = arith.constant 0 : index
    %c0_67 = arith.constant 0 : index
    %137 = vector.load %arg6[%c0_66, %c0_67] : memref<8x128xf32, #tpu.memory_space<vmem>>, vector<8x128xf32>
    %138 = arith.truncf %137 : vector<8x128xf32> to vector<8x128xbf16>
    %c0_68 = arith.constant 0 : index
    %c0_69 = arith.constant 0 : index
    %139 = vector.load %arg3[%c0_68, %c0_69] : memref<128x512xbf16, #tpu.memory_space<vmem>>, vector<128x512xbf16>
    %cst_70 = arith.constant dense<0.000000e+00> : vector<8x512xf32>
    %140 = tpu.matmul %138, %139, %cst_70 {dimension_numbers = #tpu.dot_dimension_numbers<[1], [0], [0], [1], [0, 0, 1, 1], [], []>} : vector<8x128xbf16>, vector<128x512xbf16>, vector<8x512xf32> -> vector<8x512xf32>
    %141 = arith.addf %136, %140 : vector<8x512xf32>
    %142 = vector.extract_strided_slice %141 {offsets = [0, 0], sizes = [8, 128], strides = [1, 1]} : vector<8x512xf32> to vector<8x128xf32>
    %143 = arith.negf %142 : vector<8x128xf32>
    %144 = math.exp %143 : vector<8x128xf32>
    %cst_71 = arith.constant 1.000000e+00 : f32
    %145 = vector.broadcast %cst_71 : f32 to vector<8x128xf32>
    %146 = arith.addf %145, %144 : vector<8x128xf32>
    %147 = arith.divf %145, %146 : vector<8x128xf32>
    %148 = vector.extract_strided_slice %141 {offsets = [0, 128], sizes = [8, 128], strides = [1, 1]} : vector<8x512xf32> to vector<8x128xf32>
    %149 = arith.negf %148 : vector<8x128xf32>
    %150 = math.exp %149 : vector<8x128xf32>
    %cst_72 = arith.constant 1.000000e+00 : f32
    %151 = vector.broadcast %cst_72 : f32 to vector<8x128xf32>
    %152 = arith.addf %151, %150 : vector<8x128xf32>
    %153 = arith.divf %151, %152 : vector<8x128xf32>
    %154 = vector.extract_strided_slice %141 {offsets = [0, 256], sizes = [8, 128], strides = [1, 1]} : vector<8x512xf32> to vector<8x128xf32>
    %155 = math.tanh %154 : vector<8x128xf32>
    %156 = vector.extract_strided_slice %141 {offsets = [0, 384], sizes = [8, 128], strides = [1, 1]} : vector<8x512xf32> to vector<8x128xf32>
    %157 = arith.negf %156 : vector<8x128xf32>
    %158 = math.exp %157 : vector<8x128xf32>
    %cst_73 = arith.constant 1.000000e+00 : f32
    %159 = vector.broadcast %cst_73 : f32 to vector<8x128xf32>
    %160 = arith.addf %159, %158 : vector<8x128xf32>
    %161 = arith.divf %159, %160 : vector<8x128xf32>
    %c0_74 = arith.constant 0 : index
    %c0_75 = arith.constant 0 : index
    %162 = vector.load %arg7[%c0_74, %c0_75] : memref<8x128xf32, #tpu.memory_space<vmem>>, vector<8x128xf32>
    %163 = arith.mulf %153, %162 : vector<8x128xf32>
    %164 = arith.mulf %147, %155 : vector<8x128xf32>
    %165 = arith.addf %163, %164 : vector<8x128xf32>
    %166 = math.tanh %165 : vector<8x128xf32>
    %167 = arith.mulf %161, %166 : vector<8x128xf32>
    %c0_76 = arith.constant 0 : index
    %c0_77 = arith.constant 0 : index
    %168 = vector.load %arg7[%c0_76, %c0_77] : memref<8x128xf32, #tpu.memory_space<vmem>>, vector<8x128xf32>
    tpu.vector_store %arg7[%c0_76, %c0_77], %165 {strides = array<i32>} : memref<8x128xf32, #tpu.memory_space<vmem>>, vector<8x128xf32>,
    %c0_78 = arith.constant 0 : index
    %c0_79 = arith.constant 0 : index
    %169 = vector.load %arg6[%c0_78, %c0_79] : memref<8x128xf32, #tpu.memory_space<vmem>>, vector<8x128xf32>
    tpu.vector_store %arg6[%c0_78, %c0_79], %167 {strides = array<i32>} : memref<8x128xf32, #tpu.memory_space<vmem>>, vector<8x128xf32>,
    %170 = arith.truncf %167 : vector<8x128xf32> to vector<8x128xbf16>
    %c0_80 = arith.constant 0 : index
    %171 = arith.index_cast %c3_i32 : i32 to index
    %c0_81 = arith.constant 0 : index
    %172 = vector.load %arg5[%c0_80, %171, %c0_81] : memref<8x8x128xbf16, #tpu.memory_space<vmem>>, vector<8x1x128xbf16>
    %173 = vector.shape_cast %172 : vector<8x1x128xbf16> to vector<8x128xbf16>
    %174 = vector.shape_cast %170 : vector<8x128xbf16> to vector<8x1x128xbf16>
    tpu.vector_store %arg5[%c0_80, %171, %c0_81], %174 {strides = array<i32>} : memref<8x8x128xbf16, #tpu.memory_space<vmem>>, vector<8x1x128xbf16>,
    %c4_i32 = arith.constant 4 : i32
    %175 = arith.index_cast %c4_i32 : i32 to index
    %c0_82 = arith.constant 0 : index
    %c0_83 = arith.constant 0 : index
    %176 = vector.load %arg8[%175, %c0_82, %c0_83] : memref<8x8x512xf32, #tpu.memory_space<vmem>>, vector<1x8x512xf32>
    %177 = vector.shape_cast %176 : vector<1x8x512xf32> to vector<8x512xf32>
    %c0_84 = arith.constant 0 : index
    %c0_85 = arith.constant 0 : index
    %178 = vector.load %arg6[%c0_84, %c0_85] : memref<8x128xf32, #tpu.memory_space<vmem>>, vector<8x128xf32>
    %179 = arith.truncf %178 : vector<8x128xf32> to vector<8x128xbf16>
    %c0_86 = arith.constant 0 : index
    %c0_87 = arith.constant 0 : index
    %180 = vector.load %arg3[%c0_86, %c0_87] : memref<128x512xbf16, #tpu.memory_space<vmem>>, vector<128x512xbf16>
    %cst_88 = arith.constant dense<0.000000e+00> : vector<8x512xf32>
    %181 = tpu.matmul %179, %180, %cst_88 {dimension_numbers = #tpu.dot_dimension_numbers<[1], [0], [0], [1], [0, 0, 1, 1], [], []>} : vector<8x128xbf16>, vector<128x512xbf16>, vector<8x512xf32> -> vector<8x512xf32>
    %182 = arith.addf %177, %181 : vector<8x512xf32>
    %183 = vector.extract_strided_slice %182 {offsets = [0, 0], sizes = [8, 128], strides = [1, 1]} : vector<8x512xf32> to vector<8x128xf32>
    %184 = arith.negf %183 : vector<8x128xf32>
    %185 = math.exp %184 : vector<8x128xf32>
    %cst_89 = arith.constant 1.000000e+00 : f32
    %186 = vector.broadcast %cst_89 : f32 to vector<8x128xf32>
    %187 = arith.addf %186, %185 : vector<8x128xf32>
    %188 = arith.divf %186, %187 : vector<8x128xf32>
    %189 = vector.extract_strided_slice %182 {offsets = [0, 128], sizes = [8, 128], strides = [1, 1]} : vector<8x512xf32> to vector<8x128xf32>
    %190 = arith.negf %189 : vector<8x128xf32>
    %191 = math.exp %190 : vector<8x128xf32>
    %cst_90 = arith.constant 1.000000e+00 : f32
    %192 = vector.broadcast %cst_90 : f32 to vector<8x128xf32>
    %193 = arith.addf %192, %191 : vector<8x128xf32>
    %194 = arith.divf %192, %193 : vector<8x128xf32>
    %195 = vector.extract_strided_slice %182 {offsets = [0, 256], sizes = [8, 128], strides = [1, 1]} : vector<8x512xf32> to vector<8x128xf32>
    %196 = math.tanh %195 : vector<8x128xf32>
    %197 = vector.extract_strided_slice %182 {offsets = [0, 384], sizes = [8, 128], strides = [1, 1]} : vector<8x512xf32> to vector<8x128xf32>
    %198 = arith.negf %197 : vector<8x128xf32>
    %199 = math.exp %198 : vector<8x128xf32>
    %cst_91 = arith.constant 1.000000e+00 : f32
    %200 = vector.broadcast %cst_91 : f32 to vector<8x128xf32>
    %201 = arith.addf %200, %199 : vector<8x128xf32>
    %202 = arith.divf %200, %201 : vector<8x128xf32>
    %c0_92 = arith.constant 0 : index
    %c0_93 = arith.constant 0 : index
    %203 = vector.load %arg7[%c0_92, %c0_93] : memref<8x128xf32, #tpu.memory_space<vmem>>, vector<8x128xf32>
    %204 = arith.mulf %194, %203 : vector<8x128xf32>
    %205 = arith.mulf %188, %196 : vector<8x128xf32>
    %206 = arith.addf %204, %205 : vector<8x128xf32>
    %207 = math.tanh %206 : vector<8x128xf32>
    %208 = arith.mulf %202, %207 : vector<8x128xf32>
    %c0_94 = arith.constant 0 : index
    %c0_95 = arith.constant 0 : index
    %209 = vector.load %arg7[%c0_94, %c0_95] : memref<8x128xf32, #tpu.memory_space<vmem>>, vector<8x128xf32>
    tpu.vector_store %arg7[%c0_94, %c0_95], %206 {strides = array<i32>} : memref<8x128xf32, #tpu.memory_space<vmem>>, vector<8x128xf32>,
    %c0_96 = arith.constant 0 : index
    %c0_97 = arith.constant 0 : index
    %210 = vector.load %arg6[%c0_96, %c0_97] : memref<8x128xf32, #tpu.memory_space<vmem>>, vector<8x128xf32>
    tpu.vector_store %arg6[%c0_96, %c0_97], %208 {strides = array<i32>} : memref<8x128xf32, #tpu.memory_space<vmem>>, vector<8x128xf32>,
    %211 = arith.truncf %208 : vector<8x128xf32> to vector<8x128xbf16>
    %c0_98 = arith.constant 0 : index
    %212 = arith.index_cast %c4_i32 : i32 to index
    %c0_99 = arith.constant 0 : index
    %213 = vector.load %arg5[%c0_98, %212, %c0_99] : memref<8x8x128xbf16, #tpu.memory_space<vmem>>, vector<8x1x128xbf16>
    %214 = vector.shape_cast %213 : vector<8x1x128xbf16> to vector<8x128xbf16>
    %215 = vector.shape_cast %211 : vector<8x128xbf16> to vector<8x1x128xbf16>
    tpu.vector_store %arg5[%c0_98, %212, %c0_99], %215 {strides = array<i32>} : memref<8x8x128xbf16, #tpu.memory_space<vmem>>, vector<8x1x128xbf16>,
    %c5_i32 = arith.constant 5 : i32
    %216 = arith.index_cast %c5_i32 : i32 to index
    %c0_100 = arith.constant 0 : index
    %c0_101 = arith.constant 0 : index
    %217 = vector.load %arg8[%216, %c0_100, %c0_101] : memref<8x8x512xf32, #tpu.memory_space<vmem>>, vector<1x8x512xf32>
    %218 = vector.shape_cast %217 : vector<1x8x512xf32> to vector<8x512xf32>
    %c0_102 = arith.constant 0 : index
    %c0_103 = arith.constant 0 : index
    %219 = vector.load %arg6[%c0_102, %c0_103] : memref<8x128xf32, #tpu.memory_space<vmem>>, vector<8x128xf32>
    %220 = arith.truncf %219 : vector<8x128xf32> to vector<8x128xbf16>
    %c0_104 = arith.constant 0 : index
    %c0_105 = arith.constant 0 : index
    %221 = vector.load %arg3[%c0_104, %c0_105] : memref<128x512xbf16, #tpu.memory_space<vmem>>, vector<128x512xbf16>
    %cst_106 = arith.constant dense<0.000000e+00> : vector<8x512xf32>
    %222 = tpu.matmul %220, %221, %cst_106 {dimension_numbers = #tpu.dot_dimension_numbers<[1], [0], [0], [1], [0, 0, 1, 1], [], []>} : vector<8x128xbf16>, vector<128x512xbf16>, vector<8x512xf32> -> vector<8x512xf32>
    %223 = arith.addf %218, %222 : vector<8x512xf32>
    %224 = vector.extract_strided_slice %223 {offsets = [0, 0], sizes = [8, 128], strides = [1, 1]} : vector<8x512xf32> to vector<8x128xf32>
    %225 = arith.negf %224 : vector<8x128xf32>
    %226 = math.exp %225 : vector<8x128xf32>
    %cst_107 = arith.constant 1.000000e+00 : f32
    %227 = vector.broadcast %cst_107 : f32 to vector<8x128xf32>
    %228 = arith.addf %227, %226 : vector<8x128xf32>
    %229 = arith.divf %227, %228 : vector<8x128xf32>
    %230 = vector.extract_strided_slice %223 {offsets = [0, 128], sizes = [8, 128], strides = [1, 1]} : vector<8x512xf32> to vector<8x128xf32>
    %231 = arith.negf %230 : vector<8x128xf32>
    %232 = math.exp %231 : vector<8x128xf32>
    %cst_108 = arith.constant 1.000000e+00 : f32
    %233 = vector.broadcast %cst_108 : f32 to vector<8x128xf32>
    %234 = arith.addf %233, %232 : vector<8x128xf32>
    %235 = arith.divf %233, %234 : vector<8x128xf32>
    %236 = vector.extract_strided_slice %223 {offsets = [0, 256], sizes = [8, 128], strides = [1, 1]} : vector<8x512xf32> to vector<8x128xf32>
    %237 = math.tanh %236 : vector<8x128xf32>
    %238 = vector.extract_strided_slice %223 {offsets = [0, 384], sizes = [8, 128], strides = [1, 1]} : vector<8x512xf32> to vector<8x128xf32>
    %239 = arith.negf %238 : vector<8x128xf32>
    %240 = math.exp %239 : vector<8x128xf32>
    %cst_109 = arith.constant 1.000000e+00 : f32
    %241 = vector.broadcast %cst_109 : f32 to vector<8x128xf32>
    %242 = arith.addf %241, %240 : vector<8x128xf32>
    %243 = arith.divf %241, %242 : vector<8x128xf32>
    %c0_110 = arith.constant 0 : index
    %c0_111 = arith.constant 0 : index
    %244 = vector.load %arg7[%c0_110, %c0_111] : memref<8x128xf32, #tpu.memory_space<vmem>>, vector<8x128xf32>
    %245 = arith.mulf %235, %244 : vector<8x128xf32>
    %246 = arith.mulf %229, %237 : vector<8x128xf32>
    %247 = arith.addf %245, %246 : vector<8x128xf32>
    %248 = math.tanh %247 : vector<8x128xf32>
    %249 = arith.mulf %243, %248 : vector<8x128xf32>
    %c0_112 = arith.constant 0 : index
    %c0_113 = arith.constant 0 : index
    %250 = vector.load %arg7[%c0_112, %c0_113] : memref<8x128xf32, #tpu.memory_space<vmem>>, vector<8x128xf32>
    tpu.vector_store %arg7[%c0_112, %c0_113], %247 {strides = array<i32>} : memref<8x128xf32, #tpu.memory_space<vmem>>, vector<8x128xf32>,
    %c0_114 = arith.constant 0 : index
    %c0_115 = arith.constant 0 : index
    %251 = vector.load %arg6[%c0_114, %c0_115] : memref<8x128xf32, #tpu.memory_space<vmem>>, vector<8x128xf32>
    tpu.vector_store %arg6[%c0_114, %c0_115], %249 {strides = array<i32>} : memref<8x128xf32, #tpu.memory_space<vmem>>, vector<8x128xf32>,
    %252 = arith.truncf %249 : vector<8x128xf32> to vector<8x128xbf16>
    %c0_116 = arith.constant 0 : index
    %253 = arith.index_cast %c5_i32 : i32 to index
    %c0_117 = arith.constant 0 : index
    %254 = vector.load %arg5[%c0_116, %253, %c0_117] : memref<8x8x128xbf16, #tpu.memory_space<vmem>>, vector<8x1x128xbf16>
    %255 = vector.shape_cast %254 : vector<8x1x128xbf16> to vector<8x128xbf16>
    %256 = vector.shape_cast %252 : vector<8x128xbf16> to vector<8x1x128xbf16>
    tpu.vector_store %arg5[%c0_116, %253, %c0_117], %256 {strides = array<i32>} : memref<8x8x128xbf16, #tpu.memory_space<vmem>>, vector<8x1x128xbf16>,
    %c6_i32 = arith.constant 6 : i32
    %257 = arith.index_cast %c6_i32 : i32 to index
    %c0_118 = arith.constant 0 : index
    %c0_119 = arith.constant 0 : index
    %258 = vector.load %arg8[%257, %c0_118, %c0_119] : memref<8x8x512xf32, #tpu.memory_space<vmem>>, vector<1x8x512xf32>
    %259 = vector.shape_cast %258 : vector<1x8x512xf32> to vector<8x512xf32>
    %c0_120 = arith.constant 0 : index
    %c0_121 = arith.constant 0 : index
    %260 = vector.load %arg6[%c0_120, %c0_121] : memref<8x128xf32, #tpu.memory_space<vmem>>, vector<8x128xf32>
    %261 = arith.truncf %260 : vector<8x128xf32> to vector<8x128xbf16>
    %c0_122 = arith.constant 0 : index
    %c0_123 = arith.constant 0 : index
    %262 = vector.load %arg3[%c0_122, %c0_123] : memref<128x512xbf16, #tpu.memory_space<vmem>>, vector<128x512xbf16>
    %cst_124 = arith.constant dense<0.000000e+00> : vector<8x512xf32>
    %263 = tpu.matmul %261, %262, %cst_124 {dimension_numbers = #tpu.dot_dimension_numbers<[1], [0], [0], [1], [0, 0, 1, 1], [], []>} : vector<8x128xbf16>, vector<128x512xbf16>, vector<8x512xf32> -> vector<8x512xf32>
    %264 = arith.addf %259, %263 : vector<8x512xf32>
    %265 = vector.extract_strided_slice %264 {offsets = [0, 0], sizes = [8, 128], strides = [1, 1]} : vector<8x512xf32> to vector<8x128xf32>
    %266 = arith.negf %265 : vector<8x128xf32>
    %267 = math.exp %266 : vector<8x128xf32>
    %cst_125 = arith.constant 1.000000e+00 : f32
    %268 = vector.broadcast %cst_125 : f32 to vector<8x128xf32>
    %269 = arith.addf %268, %267 : vector<8x128xf32>
    %270 = arith.divf %268, %269 : vector<8x128xf32>
    %271 = vector.extract_strided_slice %264 {offsets = [0, 128], sizes = [8, 128], strides = [1, 1]} : vector<8x512xf32> to vector<8x128xf32>
    %272 = arith.negf %271 : vector<8x128xf32>
    %273 = math.exp %272 : vector<8x128xf32>
    %cst_126 = arith.constant 1.000000e+00 : f32
    %274 = vector.broadcast %cst_126 : f32 to vector<8x128xf32>
    %275 = arith.addf %274, %273 : vector<8x128xf32>
    %276 = arith.divf %274, %275 : vector<8x128xf32>
    %277 = vector.extract_strided_slice %264 {offsets = [0, 256], sizes = [8, 128], strides = [1, 1]} : vector<8x512xf32> to vector<8x128xf32>
    %278 = math.tanh %277 : vector<8x128xf32>
    %279 = vector.extract_strided_slice %264 {offsets = [0, 384], sizes = [8, 128], strides = [1, 1]} : vector<8x512xf32> to vector<8x128xf32>
    %280 = arith.negf %279 : vector<8x128xf32>
    %281 = math.exp %280 : vector<8x128xf32>
    %cst_127 = arith.constant 1.000000e+00 : f32
    %282 = vector.broadcast %cst_127 : f32 to vector<8x128xf32>
    %283 = arith.addf %282, %281 : vector<8x128xf32>
    %284 = arith.divf %282, %283 : vector<8x128xf32>
    %c0_128 = arith.constant 0 : index
    %c0_129 = arith.constant 0 : index
    %285 = vector.load %arg7[%c0_128, %c0_129] : memref<8x128xf32, #tpu.memory_space<vmem>>, vector<8x128xf32>
    %286 = arith.mulf %276, %285 : vector<8x128xf32>
    %287 = arith.mulf %270, %278 : vector<8x128xf32>
    %288 = arith.addf %286, %287 : vector<8x128xf32>
    %289 = math.tanh %288 : vector<8x128xf32>
    %290 = arith.mulf %284, %289 : vector<8x128xf32>
    %c0_130 = arith.constant 0 : index
    %c0_131 = arith.constant 0 : index
    %291 = vector.load %arg7[%c0_130, %c0_131] : memref<8x128xf32, #tpu.memory_space<vmem>>, vector<8x128xf32>
    tpu.vector_store %arg7[%c0_130, %c0_131], %288 {strides = array<i32>} : memref<8x128xf32, #tpu.memory_space<vmem>>, vector<8x128xf32>,
    %c0_132 = arith.constant 0 : index
    %c0_133 = arith.constant 0 : index
    %292 = vector.load %arg6[%c0_132, %c0_133] : memref<8x128xf32, #tpu.memory_space<vmem>>, vector<8x128xf32>
    tpu.vector_store %arg6[%c0_132, %c0_133], %290 {strides = array<i32>} : memref<8x128xf32, #tpu.memory_space<vmem>>, vector<8x128xf32>,
    %293 = arith.truncf %290 : vector<8x128xf32> to vector<8x128xbf16>
    %c0_134 = arith.constant 0 : index
    %294 = arith.index_cast %c6_i32 : i32 to index
    %c0_135 = arith.constant 0 : index
    %295 = vector.load %arg5[%c0_134, %294, %c0_135] : memref<8x8x128xbf16, #tpu.memory_space<vmem>>, vector<8x1x128xbf16>
    %296 = vector.shape_cast %295 : vector<8x1x128xbf16> to vector<8x128xbf16>
    %297 = vector.shape_cast %293 : vector<8x128xbf16> to vector<8x1x128xbf16>
    tpu.vector_store %arg5[%c0_134, %294, %c0_135], %297 {strides = array<i32>} : memref<8x8x128xbf16, #tpu.memory_space<vmem>>, vector<8x1x128xbf16>,
    %c7_i32 = arith.constant 7 : i32
    %298 = arith.index_cast %c7_i32 : i32 to index
    %c0_136 = arith.constant 0 : index
    %c0_137 = arith.constant 0 : index
    %299 = vector.load %arg8[%298, %c0_136, %c0_137] : memref<8x8x512xf32, #tpu.memory_space<vmem>>, vector<1x8x512xf32>
    %300 = vector.shape_cast %299 : vector<1x8x512xf32> to vector<8x512xf32>
    %c0_138 = arith.constant 0 : index
    %c0_139 = arith.constant 0 : index
    %301 = vector.load %arg6[%c0_138, %c0_139] : memref<8x128xf32, #tpu.memory_space<vmem>>, vector<8x128xf32>
    %302 = arith.truncf %301 : vector<8x128xf32> to vector<8x128xbf16>
    %c0_140 = arith.constant 0 : index
    %c0_141 = arith.constant 0 : index
    %303 = vector.load %arg3[%c0_140, %c0_141] : memref<128x512xbf16, #tpu.memory_space<vmem>>, vector<128x512xbf16>
    %cst_142 = arith.constant dense<0.000000e+00> : vector<8x512xf32>
    %304 = tpu.matmul %302, %303, %cst_142 {dimension_numbers = #tpu.dot_dimension_numbers<[1], [0], [0], [1], [0, 0, 1, 1], [], []>} : vector<8x128xbf16>, vector<128x512xbf16>, vector<8x512xf32> -> vector<8x512xf32>
    %305 = arith.addf %300, %304 : vector<8x512xf32>
    %306 = vector.extract_strided_slice %305 {offsets = [0, 0], sizes = [8, 128], strides = [1, 1]} : vector<8x512xf32> to vector<8x128xf32>
    %307 = arith.negf %306 : vector<8x128xf32>
    %308 = math.exp %307 : vector<8x128xf32>
    %cst_143 = arith.constant 1.000000e+00 : f32
    %309 = vector.broadcast %cst_143 : f32 to vector<8x128xf32>
    %310 = arith.addf %309, %308 : vector<8x128xf32>
    %311 = arith.divf %309, %310 : vector<8x128xf32>
    %312 = vector.extract_strided_slice %305 {offsets = [0, 128], sizes = [8, 128], strides = [1, 1]} : vector<8x512xf32> to vector<8x128xf32>
    %313 = arith.negf %312 : vector<8x128xf32>
    %314 = math.exp %313 : vector<8x128xf32>
    %cst_144 = arith.constant 1.000000e+00 : f32
    %315 = vector.broadcast %cst_144 : f32 to vector<8x128xf32>
    %316 = arith.addf %315, %314 : vector<8x128xf32>
    %317 = arith.divf %315, %316 : vector<8x128xf32>
    %318 = vector.extract_strided_slice %305 {offsets = [0, 256], sizes = [8, 128], strides = [1, 1]} : vector<8x512xf32> to vector<8x128xf32>
    %319 = math.tanh %318 : vector<8x128xf32>
    %320 = vector.extract_strided_slice %305 {offsets = [0, 384], sizes = [8, 128], strides = [1, 1]} : vector<8x512xf32> to vector<8x128xf32>
    %321 = arith.negf %320 : vector<8x128xf32>
    %322 = math.exp %321 : vector<8x128xf32>
    %cst_145 = arith.constant 1.000000e+00 : f32
    %323 = vector.broadcast %cst_145 : f32 to vector<8x128xf32>
    %324 = arith.addf %323, %322 : vector<8x128xf32>
    %325 = arith.divf %323, %324 : vector<8x128xf32>
    %c0_146 = arith.constant 0 : index
    %c0_147 = arith.constant 0 : index
    %326 = vector.load %arg7[%c0_146, %c0_147] : memref<8x128xf32, #tpu.memory_space<vmem>>, vector<8x128xf32>
    %327 = arith.mulf %317, %326 : vector<8x128xf32>
    %328 = arith.mulf %311, %319 : vector<8x128xf32>
    %329 = arith.addf %327, %328 : vector<8x128xf32>
    %330 = math.tanh %329 : vector<8x128xf32>
    %331 = arith.mulf %325, %330 : vector<8x128xf32>
    %c0_148 = arith.constant 0 : index
    %c0_149 = arith.constant 0 : index
    %332 = vector.load %arg7[%c0_148, %c0_149] : memref<8x128xf32, #tpu.memory_space<vmem>>, vector<8x128xf32>
    tpu.vector_store %arg7[%c0_148, %c0_149], %329 {strides = array<i32>} : memref<8x128xf32, #tpu.memory_space<vmem>>, vector<8x128xf32>,
    %c0_150 = arith.constant 0 : index
    %c0_151 = arith.constant 0 : index
    %333 = vector.load %arg6[%c0_150, %c0_151] : memref<8x128xf32, #tpu.memory_space<vmem>>, vector<8x128xf32>
    tpu.vector_store %arg6[%c0_150, %c0_151], %331 {strides = array<i32>} : memref<8x128xf32, #tpu.memory_space<vmem>>, vector<8x128xf32>,
    %334 = arith.truncf %331 : vector<8x128xf32> to vector<8x128xbf16>
    %c0_152 = arith.constant 0 : index
    %335 = arith.index_cast %c7_i32 : i32 to index
    %c0_153 = arith.constant 0 : index
    %336 = vector.load %arg5[%c0_152, %335, %c0_153] : memref<8x8x128xbf16, #tpu.memory_space<vmem>>, vector<8x1x128xbf16>
    %337 = vector.shape_cast %336 : vector<8x1x128xbf16> to vector<8x128xbf16>
    %338 = vector.shape_cast %334 : vector<8x128xbf16> to vector<8x1x128xbf16>
    tpu.vector_store %arg5[%c0_152, %335, %c0_153], %338 {strides = array<i32>} : memref<8x8x128xbf16, #tpu.memory_space<vmem>>, vector<8x1x128xbf16>,
    %c8_i32 = arith.constant 8 : i32
    return
  }
  func.func @transform_0(%arg0: i32) -> (i32, i32) {
    %c0_i32 = arith.constant 0 : i32
    %c0_i32_0 = arith.constant 0 : i32
    return %arg0, %c0_i32 : i32, i32
  }
  func.func @transform_1(%arg0: i32) -> (i32, i32) {
    %c0_i32 = arith.constant 0 : i32
    %c0_i32_0 = arith.constant 0 : i32
    %c0_i32_1 = arith.constant 0 : i32
    return %c0_i32, %c0_i32_0 : i32, i32
  }
  func.func @transform_2(%arg0: i32) -> (i32, i32) {
    %c0_i32 = arith.constant 0 : i32
    %c0_i32_0 = arith.constant 0 : i32
    %c0_i32_1 = arith.constant 0 : i32
    return %c0_i32, %c0_i32_0 : i32, i32
  }
  func.func @transform_3(%arg0: i32) -> (i32, i32) {
    %c0_i32 = arith.constant 0 : i32
    %c0_i32_0 = arith.constant 0 : i32
    %c0_i32_1 = arith.constant 0 : i32
    return %c0_i32, %c0_i32_0 : i32, i32
  }
  func.func @transform_4(%arg0: i32) -> (i32, i32, i32) {
    %c0_i32 = arith.constant 0 : i32
    %c0_i32_0 = arith.constant 0 : i32
    %c0_i32_1 = arith.constant 0 : i32
    return %c0_i32, %arg0, %c0_i32_0 : i32, i32, i32
  }
}

</mosaic_0001>

<bundles_post_ra>
// kernel: tpu_custom_call.1
= control target key start
LH: loop header
LB: loop body
LE: loop exit
PB: predicated region body
PF: predicated region fallthrough
CT: control target
= control target key end

     0   :  { %9 = vsyncpa [#allocation6], 0  ;;  %s6124_s0 = inlined_call_operand.vmem [shape: bf16[128,16], index: 0, kind: input, shape index: {}]   ;;  %s6125_s1 = inlined_call_operand.vmem [shape: bf16[16,512], index: 1, kind: input, shape index: {}]   ;;  %s6126_s2 = inlined_call_operand.hbm [shape: bf16[128,512], index: 2, kind: input, shape index: {}]   ;;  %s6127_s3 = inlined_call_operand.vmem [shape: f32[1,512], index: 3, kind: input, shape index: {}]   ;;  %s6128_s4 = inlined_call_operand.hbm [shape: bf16[8,16,128], index: 4, kind: output, shape index: {}]  }
   0x1   :  { %10 = vsyncpa [#allocation7], 0 }
   0x2   :  { %12 = vsyncpa [#allocation7 + $0x1], 0  ;;  %s4942_s15 = smov 0   ;;  %s4944_s16 = smov 0  }
   0x3   :  { %s4946_s17 = smov 0   ;;  %s4948_s18 = smov 0  }
   0x4 LB: > { %s4963_s19 = sadd.s32 4294967295, %s4904_s18   ;;  %s4127_s20 = sadd.s32 4294967294, %s4904_s18   ;;  %s4904_s18 = sphi %s4948_s18, %s6204_s18   ;;  %s4900_s17 = sphi %s4946_s17, %s6203_s17   ;;  %s4896_s16 = sphi %s4944_s16, %s6202_s16   ;;  %s4892_s15 = sphi %s4942_s15, %s6201_s15  }
   0x5   : > { %s4967_s21 = sadd.s32 1, %s4904_s18   ;;  %s114_s22 = sadd.s32 1, %s4900_s17 }
   0x6   : > { %s111_s23 = ssub.s32 %s4904_s18, %s4967_s21  ;;  %p124_p0 = scmp.ne.s32.totalorder %s4900_s17, %s4896_s16 }
   0x7   : > { %p112_p1 = scmp.eq.s32.totalorder %s111_s23, 0  ;;  %p125_p2 = scmp.eq.s32.totalorder %s4963_s19, 1 }
   0x8   : > { %p130_p3 = scmp.ne.s32.totalorder %s4896_s16, %s4892_s15  ;;  %p131_p4 = scmp.eq.s32.totalorder %s4127_s20, 1 }
   0x9   : > { %s4978_s24 = scalar_select %p112_p1, %s4900_s17, %s114_s22  }
   0xa   : > { %p4980_p5 = por %p125_p2, %p124_p0  ;;  %p4984_p6 = por %p131_p4, %p130_p3 }
   0xb   : > { %p4128_p7 = scmp.ge.s32.totalorder %s4904_s18, 1  ;;  %p138_p8 = scmp.lt.s32.totalorder %s4904_s18, 3 }
   0xc   : > { %s6134_s25 = scalar_select %p4980_p5, 1, 0 }
   0xd   : > { %s6135_s26 = scalar_select %p4984_p6, 1, 0 }
   0xe   : > { %p6129_p10 = scmp.eq.s32.totalorder %s4963_s19, 0  ;;  %p4992_p11 = pnand %p4128_p7, %p138_p8 }
   0xf   : > { %s4906_s28 = smov [#allocation5]   ;;  %s4810_s7 = scalar_lea.hbm %s6126_s2, 4096 }
  0x10   : > { %s6136_s27 = scalar_select %p4992_p11, 1, 0 }
  0x11   : > { %s153_s29 = sshll.u32 %s4906_s28, 4  ;;  %p4475_p12 = pneg %p4992_p11  ;;  %s154_s29 = int_to_ptr.vmem [resolvable:$true] %s153_s29 }
  0x12   : > { %p4811_p0 = scmp.ne.s32.totalorder %s6126_s2, %s4810_s7  ;;  %p4817_p4 = scmp.lt.u32.totalorder %s4810_s7, %s6126_s2 }
  0x13   : > { %p5000_p13 = pnand %p6129_p10, %p4475_p12 }
  0x15   : > { %p4812_p1 = pneg %p5000_p13 }
  0x17   : > { %p4813_p2 = pnand %p4812_p1, %p4811_p0 }
  0x19   : > { %p4814_p3 = pneg %p4813_p2 }
  0x1b   : > { %p4819_p7 = pnand %p4817_p4, %p4814_p3 }
  0x1d   : > { %4822 = shalt.err (!%p4819_p7)
}
  0x1e   : > { %s4823_s12 = scalar_lea.vmem %s154_s29, 4096  ;;  %p4831_p10 = scmp.lt.s32.totalorder %s154_s29, %s154_s29 }
  0x1f   : > { %p4824_p8 = scmp.ne.s32.totalorder %s154_s29, %s4823_s12  ;;  %p4832_p6 = scmp.lt.s32.totalorder %s4823_s12, %s4823_s12 }
  0x21   : > { %p4826_p12 = pnand %p4824_p8, %p4812_p1  ;;  %p4833_p5 = por %p4832_p6, %p4831_p10 }
  0x23   : > { %p4827_p9 = pneg %p4826_p12 }
  0x25   : > { %p4834_p11 = pnand %p4833_p5, %p4827_p9 }
  0x27   : > { %4837 = shalt.err (!%p4834_p11)
}
  0x28   : > { %s4907_s13 = smov 256   ;;  %s4908_s14 = smov 16  }
  0x29   : > { %4478 = dma.hbm_to_vmem [thread:$0]  (!%p5000_p13), %s6126_s2, 4096, %s154_s29, [#allocation6], %s4907_s13, %s4907_s13, %s4908_s14  }
  0x2a   : > { %p6138_p0 = scmp.ne.s32.totalorder %s6136_s27, 0 }
  0x2c   : > { %181 = sbr.rel (%p6138_p0) target bundleno = 2214 (0x8a6), region = 36 }
  0x33   : > { %p6139_p2 = scmp.eq.s32.totalorder %s4963_s19, 0 }
  0x35   : > { %4883 = dma.done.wait (%p6139_p2), [#allocation6], 4096   ;;  %p6140_p1 = pmov %p6139_p2 }
  0x36   : > { %s204_s23 = sand.u32 1, %s4896_s16   ;;  %s4134_s28 = sshll.u32 %s4963_s19, 3 }
  0x37   : > { %4885 = vsyncadd (%p6140_p1), [#allocation6], 4294963200  ;;  %s4133_s30 = sshll.u32 %s204_s23, 5  ;;  %p208_p5 = scmp.lt.s32.totalorder %s4134_s28, 15 }
  0x38   : > { %s5035_s7 = scalar_lea.vmem [#allocation8], %s4133_s30  ;;  %p6141_p6 = scmp.ne.s32.totalorder %s4963_s19, 0 }
  0x39   : > { %s6206_s28 = smov (!%p208_p5, %s4134_s28), 15  ;;  %v4909_v0 = vmov (!%p6141_p6), 0.0  }
  0x3a   : > { %s4135_s5 = sshll.u32 %s6206_s28, 2  ;;  %217 = sbr.rel (%p6141_p6) target bundleno = 65 (0x41), region = 44  ;;  %218 = vst [vmem:[#allocation2] sm:$0xff] (!%p6141_p6), %v4909_v0  ;;  %219 = vst [vmem:[#allocation3] sm:$0xff] (!%p6141_p6), %v4909_v0 }
  0x3b   : > { %s5033_s27 = scalar_lea.vmem %s6124_s0, %s4135_s5 }
  0x41 PF: > { %v4528_v1 = vld [vmem:[%s6125_s1 + $0x4] ss:$16 sps:$4 sm:$0xff]   ;;  %v4530_v2 = vld [vmem:[%s6125_s1 + $0xc] ss:$16 sps:$4 sm:$0xff]   ;;  %v6132_v3 = vmov 0   ;;  %vm294_vm0 = vcmask 130048   ;;  %v234_v44 = vlaneseq }
  0x42   : > { %339 = vmatprep.mubr.bf16.mxu0 %v6132_v3  ;;  %412 = vmatprep.mubr.bf16.mxu1 %v6132_v3  ;;  %v4532_v4 = vld [vmem:[%s6125_s1] ss:$16 sps:$4 sm:$0xff]   ;;  %v4533_v5 = vld [vmem:[%s6125_s1 + $0x8] ss:$16 sps:$4 sm:$0xff]   ;;  %v5056_v8 = vld [vmem:[#allocation5 + $0x4] ss:$16 sps:$4 sm:$0xff]  }
  0x43   : > { %307 = vmatprep.subr.bf16.mxu0 %v4528_v1  ;;  %380 = vmatprep.subr.bf16.mxu1 %v4530_v2  ;;  %v4534_v6 = vld [vmem:[%s5033_s27] sm:$0xff]   ;;  %v5058_v9 = vld [vmem:[#allocation5 + $0x8] ss:$16 sps:$4 sm:$0xff]   ;;  %v5061_v10 = vld [vmem:[#allocation5 + $0xc] ss:$16 sps:$4 sm:$0xff]   ;;  %v5205_v45 = vshrl.u32 %v234_v44, 7 }
  0x44   : > { %308 = vmatpush1.bf16.msra.mxu0 %v4532_v4  ;;  %381 = vmatpush1.bf16.msra.mxu1 %v4533_v5  ;;  %v5054_v7 = vld [vmem:[#allocation5] ss:$16 sps:$4 sm:$0xff]   ;;  %v5065_v11 = vld [vmem:[#allocation5 + $0x24] ss:$16 sps:$4 sm:$0xff]   ;;  %v5071_v13 = vld [vmem:[#allocation5 + $0x2c] ss:$16 sps:$4 sm:$0xff]  }
  0x45   : > { %683 = vmatprep.subr.bf16.mxu0 %v5056_v8  ;;  %724 = vmatprep.subr.bf16.mxu1 %v5061_v10  ;;  %v5069_v12 = vld [vmem:[#allocation5 + $0x20] ss:$16 sps:$4 sm:$0xff]   ;;  %v5075_v14 = vld [vmem:[#allocation5 + $0x28] ss:$16 sps:$4 sm:$0xff]   ;;  %v5081_v16 = vld [vmem:[#allocation5 + $0x44] ss:$16 sps:$4 sm:$0xff]  }
  0x46   : > { %v4547_v15 = vld [vmem:[%s5033_s27 + $0x8] sm:$0xff]   ;;  %v5084_v17 = vld [vmem:[#allocation5 + $0x40] ss:$16 sps:$4 sm:$0xff]   ;;  %v5092_v20 = vld [vmem:[#allocation5 + $0x64] ss:$16 sps:$4 sm:$0xff]   ;;  %v244_v46 = vsub.s32 2, %v5205_v45 }
  0x47   : > { %4145 = vmatmul.mubr.msk.bf16.vlgmr.msra.gmra.mrb[0].mxu0 %vm294_vm0, %v4534_v6  ;;  %4149 = vmatmul.mubr.msk.bf16.vlgmr.msra.gmra.mrb[0].mxu1 %vm294_vm0, %v4534_v6  ;;  %v5086_v18 = vld [vmem:[#allocation5 + $0x4c] ss:$16 sps:$4 sm:$0xff]   ;;  %v5090_v19 = vld [vmem:[#allocation5 + $0x48] ss:$16 sps:$4 sm:$0xff]   ;;  %v5100_v22 = vld [vmem:[#allocation5 + $0x60] ss:$16 sps:$4 sm:$0xff]  }
  0x48   : > { %684 = vmatpush1.bf16.msra.mxu0 %v5054_v7  ;;  %725 = vmatpush1.bf16.msra.mxu1 %v5058_v9  ;;  %v5097_v21 = vld [vmem:[#allocation5 + $0x6c] ss:$16 sps:$4 sm:$0xff]   ;;  %v5105_v23 = vld [vmem:[#allocation5 + $0x68] ss:$16 sps:$4 sm:$0xff]   ;;  %v5107_v24 = vld [vmem:[#allocation5 + $0x84] ss:$16 sps:$4 sm:$0xff]  }
  0x49   : > { %685 = vmatprep.subr.bf16.mxu0 %v5065_v11  ;;  %726 = vmatprep.subr.bf16.mxu1 %v5071_v13  ;;  %v5111_v25 = vld [vmem:[#allocation5 + $0x8c] ss:$16 sps:$4 sm:$0xff]   ;;  %v4560_v26 = vld [vmem:[%s5033_s27 + $0x10] sm:$0xff]   ;;  %v5119_v28 = vld [vmem:[#allocation5 + $0x88] ss:$16 sps:$4 sm:$0xff]   ;;  %v248_v47 = vsub.s32 3, %v5205_v45 }
  0x4a   : > { %349 = vmatprep.mubr.bf16.mxu0 %v6132_v3  ;;  %422 = vmatprep.mubr.bf16.mxu1 %v6132_v3  ;;  %v5115_v27 = vld [vmem:[#allocation5 + $0x80] ss:$16 sps:$4 sm:$0xff]   ;;  %v5121_v29 = vld [vmem:[#allocation5 + $0xa4] ss:$16 sps:$4 sm:$0xff]   ;;  %v5124_v30 = vld [vmem:[#allocation5 + $0xac] ss:$16 sps:$4 sm:$0xff]  }
  0x4b   : > { %v5128_v31 = vld [vmem:[#allocation5 + $0xa0] ss:$16 sps:$4 sm:$0xff]   ;;  %v5131_v32 = vld [vmem:[#allocation5 + $0xa8] ss:$16 sps:$4 sm:$0xff]   ;;  %v5136_v33 = vld [vmem:[#allocation5 + $0xc4] ss:$16 sps:$4 sm:$0xff]  }
  0x4c   : > { %686 = vmatpush1.bf16.msra.mxu0 %v5069_v12  ;;  %727 = vmatpush1.bf16.msra.mxu1 %v5075_v14  ;;  %v4573_v34 = vld [vmem:[%s5033_s27 + $0x18] sm:$0xff]   ;;  %v5143_v36 = vld [vmem:[#allocation5 + $0xc0] ss:$16 sps:$4 sm:$0xff]   ;;  %v5148_v38 = vld [vmem:[#allocation5 + $0xe4] ss:$16 sps:$4 sm:$0xff]   ;;  %v236_v48 = vsub.s32 0, %v5205_v45 }
  0x4d   : > { %687 = vmatprep.subr.bf16.mxu0 %v5081_v16  ;;  %728 = vmatprep.subr.bf16.mxu1 %v5086_v18  ;;  %v5141_v35 = vld [vmem:[#allocation5 + $0xcc] ss:$16 sps:$4 sm:$0xff]   ;;  %v5145_v37 = vld [vmem:[#allocation5 + $0xc8] ss:$16 sps:$4 sm:$0xff]   ;;  %v5155_v40 = vld [vmem:[#allocation5 + $0xe0] ss:$16 sps:$4 sm:$0xff]  }
  0x4e   : > { %v5150_v39 = vld [vmem:[#allocation5 + $0xec] ss:$16 sps:$4 sm:$0xff]   ;;  %v489_v41 = vld [vmem:[#allocation2] sm:$0xff]  ;;  %v5159_v42 = vld [vmem:[#allocation5 + $0xe8] ss:$16 sps:$4 sm:$0xff]   ;;  %v240_v50 = vsub.s32 1, %v5205_v45 }
  0x4f   : > { %4146 = vmatmul.mubr.msk.bf16.gmra.mrb[4].mxu0 %vm294_vm0, %v4547_v15  ;;  %4150 = vmatmul.mubr.msk.bf16.gmra.mrb[4].mxu1 %vm294_vm0, %v4547_v15  ;;  %v490_v43 = vpack.c.bf16 %v489_v41, %v489_v41  ;;  %v232_v49 = vld [vmem:[%s6127_s3] sm:$0xf]  ;;  %vm902_vm1 = vcmask 1040384   ;;  %vm903_vm2 = vsmask.f32 256  ;;  %vm1791_vm6 = vcmask 1041409  }
  0x50   : > { %688 = vmatpush1.bf16.msra.mxu0 %v5084_v17  ;;  %359 = vmatprep.mubr.bf16.mxu0 %v6132_v3  ;;  %v5214_v51 = vrot.slane %v232_v49, %v244_v46  ;;  %v5220_v54 = vrot.slane %v232_v49, %v248_v47  ;;  %v237_v55 = vrot.slane %v232_v49, %v236_v48  ;;  %vm5317_vm3 = vmand %vm902_vm1, %vm903_vm2  ;;  %vm1347_vm4 = vsmask.f32 7938  ;;  %s4466_s30 = sshll.u32 %s4963_s19, 6  ;;  %s4053_s5 = sshll.u32 %s5035_s7, 4  ;;  %s6072_s5 = int_to_ptr.vmem [resolvable:$true] %s4053_s5 }
  0x51   : > { %729 = vmatpush1.bf16.msra.mxu1 %v5090_v19  ;;  %689 = vmatprep.subr.bf16.mxu0 %v5092_v20  ;;  %v241_v58 = vrot.slane %v232_v49, %v240_v50  ;;  %vm5399_vm5 = vmand %vm902_vm1, %vm1347_vm4  ;;  %vm1792_vm7 = vsmask.f32 1280  ;;  %vm2236_vm9 = vsmask.f32 7942  ;;  %vm2680_vm11 = vcmask 1042434   ;;  %s6060_s6 = scalar_lea.hbm %s6128_s4, %s4466_s30  ;;  %s6083_s27 = scalar_lea.sflag [#allocation7], %s204_s23 }
  0x52   : > { %730 = vmatprep.subr.bf16.mxu1 %v5097_v21  ;;  %432 = vmatprep.mubr.bf16.mxu1 %v6132_v3  ;;  %vm5561_vm8 = vmand %vm1791_vm6, %vm1792_vm7  ;;  %vm2681_vm12 = vsmask.f32 2304  ;;  %vm3125_vm14 = vsmask.f32 7946  ;;  %vm3570_vm1 = vsmask.f32 3328 }
  0x53   : > { %vm5651_vm10 = vmand %vm1791_vm6, %vm2236_vm9  ;;  %s4838_s8 = scalar_lea.vmem %s6072_s5, 512  ;;  %p6199_p10 = scmp.ne.s32.totalorder %s6134_s25, 0 }
  0x54   : > { %690 = vmatpush1.bf16.msra.mxu0 %v5100_v22  ;;  %vm5733_vm13 = vmand %vm2680_vm11, %vm2681_vm12  ;;  %p4839_p9 = scmp.ne.s32.totalorder %s6072_s5, %s4838_s8  ;;  %s4913_s9 = smov [#allocation8]  }
  0x55   : > { %731 = vmatpush1.bf16.msra.mxu1 %v5105_v23  ;;  %691 = vmatprep.subr.bf16.mxu0 %v5107_v24  ;;  %vm5895_vm15 = vmand %vm2680_vm11, %vm3125_vm14  ;;  %s4842_s10 = sshll.u32 %s4913_s9, 4  ;;  %s4843_s10 = int_to_ptr.vmem [resolvable:$false] %s4842_s10 }
  0x56   : > { %732 = vmatprep.subr.bf16.mxu1 %v5111_v25  ;;  %p4840_p11 = pnand %p4839_p9, %p6199_p10  ;;  %s4844_s11 = scalar_lea.vmem %s4843_s10, 1024 }
  0x57   : > { %4147 = vmatmul.mubr.msk.bf16.gmra.mrb[8].mxu0 %vm294_vm0, %v4560_v26  ;;  %4151 = vmatmul.mubr.msk.bf16.gmra.mrb[8].mxu1 %vm294_vm0, %v4560_v26  ;;  %p4845_p3 = scmp.lt.s32.totalorder %s6072_s5, %s4843_s10  ;;  %p4846_p4 = scmp.lt.s32.totalorder %s4844_s11, %s4838_s8 }
  0x58   : > { %692 = vmatpush1.bf16.msra.mxu0 %v5115_v27  ;;  %369 = vmatprep.mubr.bf16.mxu0 %v6132_v3  ;;  %p4841_p13 = pneg %p4840_p11 }
  0x59   : > { %733 = vmatpush1.bf16.msra.mxu1 %v5119_v28  ;;  %693 = vmatprep.subr.bf16.mxu0 %v5121_v29  ;;  %p4847_p7 = por %p4846_p4, %p4845_p3 }
  0x5a   : > { %734 = vmatprep.subr.bf16.mxu1 %v5124_v30  ;;  %442 = vmatprep.mubr.bf16.mxu1 %v6132_v3 }
  0x5b   : > { %p4848_p8 = pnand %p4847_p7, %p4841_p13 }
  0x5c   : > { %694 = vmatpush1.bf16.msra.mxu0 %v5128_v31 }
  0x5d   : > { %735 = vmatpush1.bf16.msra.mxu1 %v5131_v32  ;;  %695 = vmatprep.subr.bf16.mxu0 %v5136_v33 }
  0x5e   : > { %736 = vmatprep.subr.bf16.mxu1 %v5141_v35 }
  0x5f   : > { %4148 = vmatmul.mubr.msk.bf16.gmra.mrb[12].mxu0 %vm294_vm0, %v4573_v34  ;;  %4152 = vmatmul.mubr.msk.bf16.gmra.mrb[12].mxu1 %vm294_vm0, %v4573_v34  ;;  %vm3569_vm0 = vcmask 1043459  }
  0x60   : > { %696 = vmatpush1.bf16.msra.mxu0 %v5143_v36  ;;  %715 = vmatprep.mubr.bf16.mxu0 %v6132_v3  ;;  %vm5975_vm2 = vmand %vm3569_vm0, %vm3570_vm1 }
  0x61   : > { %737 = vmatpush1.bf16.msra.mxu1 %v5145_v37  ;;  %697 = vmatprep.subr.bf16.mxu0 %v5148_v38 }
  0x62   : > { %738 = vmatprep.subr.bf16.mxu1 %v5150_v39  ;;  %756 = vmatprep.mubr.bf16.mxu1 %v6132_v3 }
  0x64   : > { %698 = vmatpush1.bf16.msra.mxu0 %v5155_v40 }
  0x65   : > { %739 = vmatpush1.bf16.msra.mxu1 %v5159_v42  ;;  %1128 = vmatprep.subr.bf16.mxu0 %v5056_v8 }
  0x66   : > { %1169 = vmatprep.subr.bf16.mxu1 %v5061_v10 }
  0x67   : > { %716 = vmatmul.mubr.bf16.vlgmr.msra.gmra.mrb[16].mxu0 %v490_v43 }
  0x68   : > { %757 = vmatmul.mubr.bf16.vlgmr.msra.gmra.mrb[16].mxu1 %v490_v43  ;;  %1129 = vmatpush1.bf16.msra.mxu0 %v5054_v7 }
  0x69   : > { %1170 = vmatpush1.bf16.msra.mxu1 %v5058_v9  ;;  %1130 = vmatprep.subr.bf16.mxu0 %v5065_v11 }
  0x6a   : > { %1171 = vmatprep.subr.bf16.mxu1 %v5071_v13  ;;  %1160 = vmatprep.mubr.bf16.mxu0 %v6132_v3 }
  0x6b   : > { %1201 = vmatprep.mubr.bf16.mxu1 %v6132_v3 }
  0x6c   : > { %1131 = vmatpush1.bf16.msra.mxu0 %v5069_v12 }
  0x6d   : > { %1172 = vmatpush1.bf16.msra.mxu1 %v5075_v14  ;;  %1132 = vmatprep.subr.bf16.mxu0 %v5081_v16 }
  0x6e   : > { %1173 = vmatprep.subr.bf16.mxu1 %v5086_v18 }
  0x70   : > { %1133 = vmatpush1.bf16.msra.mxu0 %v5084_v17 }
  0x71   : > { %1174 = vmatpush1.bf16.msra.mxu1 %v5090_v19  ;;  %1134 = vmatprep.subr.bf16.mxu0 %v5092_v20 }
  0x72   : > { %1175 = vmatprep.subr.bf16.mxu1 %v5097_v21 }
  0x74   : > { %1135 = vmatpush1.bf16.msra.mxu0 %v5100_v22 }
  0x75   : > { %1176 = vmatpush1.bf16.msra.mxu1 %v5105_v23  ;;  %1136 = vmatprep.subr.bf16.mxu0 %v5107_v24 }
  0x76   : > { %1177 = vmatprep.subr.bf16.mxu1 %v5111_v25 }
  0x78   : > { %1137 = vmatpush1.bf16.msra.mxu0 %v5115_v27 }
  0x79   : > { %1178 = vmatpush1.bf16.msra.mxu1 %v5119_v28  ;;  %1138 = vmatprep.subr.bf16.mxu0 %v5121_v29 }
  0x7a   : > { %1179 = vmatprep.subr.bf16.mxu1 %v5124_v30 }
  0x7c   : > { %1139 = vmatpush1.bf16.msra.mxu0 %v5128_v31 }
  0x7d   : > { %1180 = vmatpush1.bf16.msra.mxu1 %v5131_v32  ;;  %1140 = vmatprep.subr.bf16.mxu0 %v5136_v33 }
  0x7e   : > { %1181 = vmatprep.subr.bf16.mxu1 %v5141_v35 }
  0x80   : > { %1141 = vmatpush1.bf16.msra.mxu0 %v5143_v36 }
  0x81   : > { %1182 = vmatpush1.bf16.msra.mxu1 %v5145_v37  ;;  %1142 = vmatprep.subr.bf16.mxu0 %v5148_v38 }
  0x82   : > { %1183 = vmatprep.subr.bf16.mxu1 %v5150_v39 }
  0x84   : > { %1143 = vmatpush1.bf16.msra.mxu0 %v5155_v40 }
  0x85   : > { %1184 = vmatpush1.bf16.msra.mxu1 %v5159_v42  ;;  %1572 = vmatprep.subr.bf16.mxu0 %v5056_v8 }
  0x86   : > { %1613 = vmatprep.subr.bf16.mxu1 %v5061_v10 }
 0x11a   : > { %v5216_v52 = vpop.f32.mrb[0].mxu0  ;;  %v5218_v53 = vpop.f32.mrb[0].mxu1 }
 0x11b   : > { %v343_v56 = vpop.f32.mrb[1].mxu0  ;;  %v416_v57 = vpop.f32.mrb[1].mxu1 }
 0x11c   : > { %v345_v59 = vpop.f32.mrb[2].mxu0  ;;  %v418_v60 = vpop.f32.mrb[2].mxu1 }
 0x11d   : > { %v5222_v61 = vadd.f32 %v345_v59, %v237_v55  ;;  %v347_v62 = vpop.f32.mrb[3].mxu0  ;;  %v5225_v63 = vadd.f32 %v418_v60, %v5214_v51  ;;  %v420_v0 = vpop.f32.mrb[3].mxu1 }
 0x11e   : > { %v5227_v1 = vadd.f32 %v347_v62, %v241_v58  ;;  %v5230_v2 = vadd.f32 %v420_v0, %v5220_v54 }
 0x122   : > { %v351_v4 = vpop.f32.mrb[4].mxu0  ;;  %v424_v5 = vpop.f32.mrb[4].mxu1 }
 0x123   : > { %v5232_v6 = vadd.f32 %v351_v4, %v237_v55  ;;  %v353_v8 = vpop.f32.mrb[5].mxu0  ;;  %v5235_v10 = vadd.f32 %v424_v5, %v5214_v51  ;;  %v426_v15 = vpop.f32.mrb[5].mxu1 }
 0x124   : > { %v5237_v26 = vadd.f32 %v353_v8, %v241_v58  ;;  %v355_v34 = vpop.f32.mrb[6].mxu0  ;;  %v5240_v41 = vadd.f32 %v426_v15, %v5220_v54  ;;  %v428_v43 = vpop.f32.mrb[6].mxu1 }
 0x125   : > { %v5242_v44 = vadd.f32 %v355_v34, %v237_v55  ;;  %v357_v46 = vpop.f32.mrb[7].mxu0  ;;  %v5245_v47 = vadd.f32 %v428_v43, %v5214_v51  ;;  %v430_v48 = vpop.f32.mrb[7].mxu1 }
 0x126   : > { %v5247_v49 = vadd.f32 %v357_v46, %v241_v58  ;;  %v5250_v50 = vadd.f32 %v430_v48, %v5220_v54 }
 0x127   : > { %6142 = vst [vmem:[#allocation11_spill] sm:$0xff] %v5242_v44  ;;  %6143 = vst [vmem:[#allocation12_spill] sm:$0xff] %v5245_v47 }
 0x128   : > { %6144 = vst [vmem:[#allocation13_spill] sm:$0xff] %v5247_v49  ;;  %6145 = vst [vmem:[#allocation14_spill] sm:$0xff] %v5250_v50 }
 0x12a   : > { %v361_v59 = vpop.f32.mrb[8].mxu0  ;;  %v434_v60 = vpop.f32.mrb[8].mxu1 }
 0x12b   : > { %v5252_v62 = vadd.f32 %v361_v59, %v237_v55  ;;  %v363_v0 = vpop.f32.mrb[9].mxu0  ;;  %v5255_v4 = vadd.f32 %v434_v60, %v5214_v51  ;;  %v436_v5 = vpop.f32.mrb[9].mxu1 }
 0x12c   : > { %v5257_v8 = vadd.f32 %v363_v0, %v241_v58  ;;  %v365_v15 = vpop.f32.mrb[10].mxu0  ;;  %v5260_v34 = vadd.f32 %v436_v5, %v5220_v54  ;;  %v438_v43 = vpop.f32.mrb[10].mxu1 }
 0x12d   : > { %6146 = vst [vmem:[#allocation15_spill] sm:$0xff] %v5252_v62  ;;  %6147 = vst [vmem:[#allocation16_spill] sm:$0xff] %v5255_v4  ;;  %v5262_v46 = vadd.f32 %v365_v15, %v237_v55  ;;  %v367_v48 = vpop.f32.mrb[11].mxu0  ;;  %v5265_v3 = vadd.f32 %v438_v43, %v5214_v51  ;;  %v440_v59 = vpop.f32.mrb[11].mxu1 }
 0x12e   : > { %6148 = vst [vmem:[#allocation17_spill] sm:$0xff] %v5257_v8  ;;  %6149 = vst [vmem:[#allocation18_spill] sm:$0xff] %v5260_v34  ;;  %v5267_v62 = vadd.f32 %v367_v48, %v241_v58  ;;  %v5270_v60 = vadd.f32 %v440_v59, %v5220_v54 }
 0x12f   : > { %6150 = vst [vmem:[#allocation19_spill] sm:$0xff] %v5262_v46  ;;  %6151 = vst [vmem:[#allocation20_spill] sm:$0xff] %v5265_v3 }
 0x130   : > { %6152 = vst [vmem:[#allocation21_spill] sm:$0xff] %v5267_v62  ;;  %6153 = vst [vmem:[#allocation22_spill] sm:$0xff] %v5270_v60 }
 0x132   : > { %v371_v4 = vpop.f32.mrb[12].mxu0  ;;  %v444_v0 = vpop.f32.mrb[12].mxu1 }
 0x133   : > { %v5272_v8 = vadd.f32 %v371_v4, %v237_v55  ;;  %v373_v50 = vpop.f32.mrb[13].mxu0  ;;  %v5275_v5 = vadd.f32 %v444_v0, %v5214_v51  ;;  %v446_v15 = vpop.f32.mrb[13].mxu1 }
 0x134   : > { %v5277_v46 = vadd.f32 %v373_v50, %v241_v58  ;;  %v375_v34 = vpop.f32.mrb[14].mxu0  ;;  %v5280_v43 = vadd.f32 %v446_v15, %v5220_v54  ;;  %v448_v48 = vpop.f32.mrb[14].mxu1  ;;  %v342_v50 = vadd.f32 %v5216_v52, %v237_v55  ;;  %v415_v15 = vadd.f32 %v5218_v53, %v5214_v51 }
 0x135   : > { %6154 = vst [vmem:[#allocation23_spill] sm:$0xff] %v5272_v8  ;;  %6155 = vst [vmem:[#allocation24_spill] sm:$0xff] %v5275_v5  ;;  %v5282_v62 = vadd.f32 %v375_v34, %v237_v55  ;;  %v377_v59 = vpop.f32.mrb[15].mxu0  ;;  %v5285_v60 = vadd.f32 %v448_v48, %v5214_v51  ;;  %v450_v4 = vpop.f32.mrb[15].mxu1  ;;  %v417_v34 = vadd.f32 %v416_v57, %v5220_v54 }
 0x136   : > { %6156 = vst [vmem:[#allocation25_spill] sm:$0xff] %v5277_v46  ;;  %6157 = vst [vmem:[#allocation26_spill] sm:$0xff] %v5280_v43  ;;  %v5287_v8 = vadd.f32 %v377_v59, %v241_v58  ;;  %v5290_v0 = vadd.f32 %v450_v4, %v5220_v54  ;;  %v344_v46 = vadd.f32 %v343_v56, %v241_v58  ;;  %v788_v58 = vld [vmem:[#allocation3] sm:$0xff] }
 0x137   : > { %6158 = vst [vmem:[#allocation27_spill] sm:$0xff] %v5282_v62  ;;  %6159 = vst [vmem:[#allocation28_spill] sm:$0xff] %v5285_v60 }
 0x138   : > { %6160 = vst [vmem:[#allocation29_spill] sm:$0xff] %v5287_v8  ;;  %6161 = vst [vmem:[#allocation30_spill] sm:$0xff] %v5290_v0 }
 0x13a   : > { %v717_v43 = vpop.f32.mrb[16].mxu0 }
 0x13b   : > { %v765_v62 = vadd.f32 %v717_v43, %v342_v50  ;;  %v758_v5 = vpop.f32.mrb[16].mxu1  ;;  %v719_v3 = vpop.f32.mrb[17].mxu0 }
 0x13c   : > { %v767_v48 = vadd.f32 %v758_v5, %v415_v15  ;;  %v766_v60 = vadd.f32 %v719_v3, %v344_v46  ;;  %v760_v49 = vpop.f32.mrb[17].mxu1  ;;  %v721_v59 = vpop.f32.mrb[18].mxu0  ;;  %v4912_v15 = vmov 286326784  }
 0x13d   : > { %v4185_v8 = vmul.f32 -1.442695, %v765_v62  ;;  %v768_v47 = vadd.f32 %v760_v49, %v417_v34  ;;  %v722_v4 = vpop.f32.mrb[19].mxu0  ;;  %v762_v0 = vpop.f32.mrb[18].mxu1  ;;  %v839_v34 = vunpack.c.l.s4 %v4912_v15 }
 0x13e   : > { %v4186_v44 = vmul.f32 -1.442695, %v766_v60  ;;  %v763_v52 = vpop.f32.mrb[19].mxu1 }
 0x13f   : > { %4682 = vpow2.f32 %v4185_v8  ;;  %v4187_v55 = vmul.f32 -1.442695, %v768_v47  ;;  %v840_v52 = vunpack.c.0.s8 %v839_v34 }
 0x140   : > { %4684 = vpow2.f32 %v4186_v44  ;;  %v4911_v44 = vmov 1966171168  }
 0x141   : > { %4686 = vpow2.f32 %v4187_v55  ;;  %v799_v47 = vunpack.c.l.s4 %v4911_v44 }
 0x142   : > { %4688 = vtanh.f32 %v767_v48 }
 0x143   : > { %v800_v8 = vunpack.c.0.s8 %v799_v47 }
 0x145   : > { %v5300_v59 = vsub.s32 %v800_v8, %v5205_v45  ;;  %v908_v8 = vld [vmem:[%s5035_s7 + $0x4] sm:$0x1] }
 0x149   : > { %v4683_v51 = vpop.eup %4682 }
 0x14a   : > { %v4685_v53 = vpop.eup %4684  ;;  %v772_v56 = vadd.f32 1.0, %v4683_v51 }
 0x14b   : > { %v778_v54 = vadd.f32 1.0, %v4685_v53  ;;  %v4687_v3 = vpop.eup %4686 }
 0x14c   : > { %4690 = vrcp.f32 %v772_v56  ;;  %v4689_v57 = vpop.eup %4688  ;;  %v785_v5 = vadd.f32 1.0, %v4687_v3  ;;  %v5309_v56 = vsub.s32 %v840_v52, %v5205_v45  ;;  %v923_v52 = vld [vmem:[%s5035_s7 + $0x18] sm:$0x1] }
 0x14d   : > { %4692 = vrcp.f32 %v778_v54  ;;  %v6162_v54 = vmov 0  }
 0x14e   : > { %4694 = vrcp.f32 %v785_v5 }
 0x156   : > { %v4691_v62 = vpop.eup %4690 }
 0x157   : > { %v4693_v49 = vpop.eup %4692  ;;  %v790_v46 = vmul.f32 %v4691_v62, %v4689_v57 }
 0x158   : > { %v789_v60 = vmul.f32 %v4693_v49, %v788_v58  ;;  %v4695_v0 = vpop.eup %4694  ;;  %v905_v49 = vld [vmem:[%s5035_s7] sm:$0x1] }
 0x15a   : > { %v5296_v43 = vadd.f32 %v790_v46, %v789_v60 }
 0x15c   : > { %4696 = vtanh.f32 %v5296_v43 }
 0x166   : > { %v4697_v50 = vpop.eup %4696 }
 0x167   : > { %v793_v48 = vmul.f32 %v4697_v50, %v4695_v0  ;;  %v911_v0 = vld [vmem:[%s5035_s7 + $0x8] sm:$0x1]  ;;  %v917_v50 = vld [vmem:[%s5035_s7 + $0x10] sm:$0x1] }
 0x169   : > { %v796_v4 = vpack.c.bf16 %v793_v48, %v793_v48  ;;  %v914_v48 = vld [vmem:[%s5035_s7 + $0xc] sm:$0x1] }
 0x16b   : > { %v804_v55 = vrot.slane %v796_v4, %v5300_v59  ;;  %1161 = vmatmul.mubr.bf16.vlgmr.msra.gmra.mrb[20].mxu0 %v796_v4  ;;  %1202 = vmatmul.mubr.bf16.vlgmr.msra.gmra.mrb[20].mxu1 %v796_v4  ;;  %v920_v4 = vld [vmem:[%s5035_s7 + $0x14] sm:$0x1] }
 0x16c   : > { %1573 = vmatpush1.bf16.msra.mxu0 %v5054_v7  ;;  %1614 = vmatpush1.bf16.msra.mxu1 %v5058_v9 }
 0x16d   : > { %v805_v51 = vcombine.high %v804_v55, %v804_v55  ;;  %v812_v53 = vrot.slane %v804_v55, %v5300_v59  ;;  %1574 = vmatprep.subr.bf16.mxu0 %v5065_v11  ;;  %1615 = vmatprep.subr.bf16.mxu1 %v5071_v13 }
 0x16e   : > { %1604 = vmatprep.mubr.bf16.mxu0 %v6162_v54  ;;  %1645 = vmatprep.mubr.bf16.mxu1 %v6162_v54 }
 0x16f   : > { %v819_v7 = vrot.slane %v805_v51, %v5300_v59  ;;  %v820_v9 = vcombine.high %v812_v53, %v812_v53  ;;  %v823_v3 = vunpack.i.h.s16 %v812_v53  ;;  %v4188_v57 = vpack.i.b16 %v812_v53, %v812_v53 }
 0x170   : > { %1575 = vmatpush1.bf16.msra.mxu0 %v5069_v12  ;;  %1616 = vmatpush1.bf16.msra.mxu1 %v5075_v14 }
 0x171   : > { %v821_v11 = vcombine.high %v819_v7, %v819_v7  ;;  %v825_v13 = vunpack.i.h.s16 %v819_v7  ;;  %v827_v45 = vunpack.i.h.s16 %v820_v9  ;;  %v831_v58 = vpack.i.b16 %v823_v3, %v823_v3  ;;  %1576 = vmatprep.subr.bf16.mxu0 %v5081_v16  ;;  %1617 = vmatprep.subr.bf16.mxu1 %v5086_v18 }
 0x172   : > { %v4189_v12 = vpack.i.b16 %v819_v7, %v819_v7  ;;  %v4190_v14 = vpack.i.b16 %v820_v9, %v820_v9  ;;  %v844_v46 = vrot.slane %v4188_v57, %v5309_v56  ;;  %v926_v57 = vld [vmem:[%s5035_s7 + $0x1c] sm:$0x1] }
 0x173   : > { %v829_v5 = vunpack.i.h.s16 %v821_v11  ;;  %v833_v60 = vpack.i.b16 %v825_v13, %v825_v13  ;;  %v835_v44 = vpack.i.b16 %v827_v45, %v827_v45  ;;  %v4191_v47 = vpack.i.b16 %v821_v11, %v821_v11 }
 0x174   : > { %v851_v15 = vrot.slane %v831_v58, %v5309_v56  ;;  %v858_v16 = vrot.slane %v4189_v12, %v5309_v56  ;;  %v872_v18 = vrot.slane %v4190_v14, %v5309_v56  ;;  %v906_v34 = vsel %vm5317_vm3, %v844_v46, %v905_v49  ;;  %1577 = vmatpush1.bf16.msra.mxu0 %v5084_v17 }
 0x175   : > { %v837_v55 = vpack.i.b16 %v829_v5, %v829_v5  ;;  %v865_v51 = vrot.slane %v833_v60, %v5309_v56  ;;  %v879_v53 = vrot.slane %v835_v44, %v5309_v56  ;;  %v886_v7 = vrot.slane %v4191_v47, %v5309_v56  ;;  %907 = vst [vmem:[%s5035_s7] sm:$0x1] %v906_v34 }
 0x176   : > { %1618 = vmatpush1.bf16.msra.mxu1 %v5090_v19  ;;  %v909_v9 = vsel %vm5317_vm3, %v851_v15, %v908_v8  ;;  %v912_v17 = vsel %vm5317_vm3, %v858_v16, %v911_v0  ;;  %v918_v3 = vsel %vm5317_vm3, %v872_v18, %v917_v50  ;;  %1578 = vmatprep.subr.bf16.mxu0 %v5092_v20 }
 0x177   : > { %1619 = vmatprep.subr.bf16.mxu1 %v5097_v21  ;;  %v893_v11 = vrot.slane %v837_v55, %v5309_v56  ;;  %910 = vst [vmem:[%s5035_s7 + $0x4] sm:$0x1] %v909_v9  ;;  %913 = vst [vmem:[%s5035_s7 + $0x8] sm:$0x1] %v912_v17  ;;  %v915_v19 = vsel %vm5317_vm3, %v865_v51, %v914_v48  ;;  %v921_v13 = vsel %vm5317_vm3, %v879_v53, %v920_v4  ;;  %v5515_v4 = vld [vmem:[#allocation5 + $0xc4] ss:$16 sps:$4 sm:$0xff]  }
 0x178   : > { %919 = vst [vmem:[%s5035_s7 + $0x10] sm:$0x1] %v918_v3  ;;  %v924_v45 = vsel %vm5317_vm3, %v886_v7, %v923_v52  ;;  %916 = vst [vmem:[%s5035_s7 + $0xc] sm:$0x1] %v915_v19  ;;  %1579 = vmatpush1.bf16.msra.mxu0 %v5100_v22 }
 0x179   : > { %922 = vst [vmem:[%s5035_s7 + $0x14] sm:$0x1] %v921_v13  ;;  %925 = vst [vmem:[%s5035_s7 + $0x18] sm:$0x1] %v924_v45  ;;  %v927_v20 = vsel %vm5317_vm3, %v893_v11, %v926_v57  ;;  %1580 = vmatprep.subr.bf16.mxu0 %v5107_v24  ;;  %vm4014_vm3 = vsmask.f32 7950 }
 0x17a   : > { %1620 = vmatpush1.bf16.msra.mxu1 %v5105_v23  ;;  %928 = vst [vmem:[%s5035_s7 + $0x1c] sm:$0x1] %v927_v20  ;;  %vm6028_vm4 = vmand %vm3569_vm0, %vm4014_vm3 }
 0x17b   : > { %1621 = vmatprep.subr.bf16.mxu1 %v5111_v25 }
 0x17c   : > { %1581 = vmatpush1.bf16.msra.mxu0 %v5115_v27  ;;  %v1349_v3 = vld [vmem:[%s5035_s7] sm:$0x1] }
 0x17d   : > { %1582 = vmatprep.subr.bf16.mxu0 %v5121_v29 }
 0x17e   : > { %1622 = vmatpush1.bf16.msra.mxu1 %v5119_v28 }
 0x17f   : > { %1623 = vmatprep.subr.bf16.mxu1 %v5124_v30 }
 0x180   : > { %1583 = vmatpush1.bf16.msra.mxu0 %v5128_v31 }
 0x181   : > { %1584 = vmatprep.subr.bf16.mxu0 %v5136_v33 }
 0x182   : > { %1624 = vmatpush1.bf16.msra.mxu1 %v5131_v32 }
 0x183   : > { %1625 = vmatprep.subr.bf16.mxu1 %v5141_v35 }
 0x184   : > { %1585 = vmatpush1.bf16.msra.mxu0 %v5143_v36 }
 0x185   : > { %1586 = vmatprep.subr.bf16.mxu0 %v5148_v38 }
 0x186   : > { %1626 = vmatpush1.bf16.msra.mxu1 %v5145_v37 }
 0x187   : > { %1627 = vmatprep.subr.bf16.mxu1 %v5150_v39 }
 0x188   : > { %1587 = vmatpush1.bf16.msra.mxu0 %v5155_v40 }
 0x18a   : > { %1628 = vmatpush1.bf16.msra.mxu1 %v5159_v42 }
 0x23e   : > { %v1162_v21 = vpop.f32.mrb[20].mxu0  ;;  %v1203_v22 = vpop.f32.mrb[20].mxu1 }
 0x23f   : > { %v1210_v23 = vadd.f32 %v1162_v21, %v5222_v61  ;;  %v1212_v24 = vadd.f32 %v1203_v22, %v5225_v63  ;;  %v1164_v25 = vpop.f32.mrb[21].mxu0  ;;  %v1205_v27 = vpop.f32.mrb[21].mxu1 }
 0x240   : > { %v1211_v28 = vadd.f32 %v1164_v25, %v5227_v1  ;;  %v1213_v29 = vadd.f32 %v1205_v27, %v5230_v2  ;;  %v1166_v30 = vpop.f32.mrb[22].mxu0  ;;  %v1207_v31 = vpop.f32.mrb[22].mxu1  ;;  %v1361_v25 = vld [vmem:[%s5035_s7 + $0x10] sm:$0x1] }
 0x241   : > { %v4224_v32 = vmul.f32 -1.442695, %v1210_v23  ;;  %v1167_v33 = vpop.f32.mrb[23].mxu0  ;;  %v1208_v35 = vpop.f32.mrb[23].mxu1  ;;  %v1352_v23 = vld [vmem:[%s5035_s7 + $0x4] sm:$0x1] }
 0x242   : > { %v4225_v36 = vmul.f32 -1.442695, %v1211_v28  ;;  %v4226_v37 = vmul.f32 -1.442695, %v1213_v29  ;;  %v1358_v29 = vld [vmem:[%s5035_s7 + $0xc] sm:$0x1] }
 0x243   : > { %4698 = vpow2.f32 %v4224_v32  ;;  %v1364_v31 = vld [vmem:[%s5035_s7 + $0x14] sm:$0x1]  ;;  %v1367_v32 = vld [vmem:[%s5035_s7 + $0x18] sm:$0x1] }
 0x244   : > { %4700 = vpow2.f32 %v4225_v36 }
 0x245   : > { %4702 = vpow2.f32 %v4226_v37 }
 0x246   : > { %4704 = vtanh.f32 %v1212_v24  ;;  %v1355_v24 = vld [vmem:[%s5035_s7 + $0x8] sm:$0x1] }
 0x24d   : > { %v4699_v38 = vpop.eup %4698 }
 0x24e   : > { %v4701_v39 = vpop.eup %4700  ;;  %v1217_v40 = vadd.f32 1.0, %v4699_v38  ;;  %v1370_v38 = vld [vmem:[%s5035_s7 + $0x1c] sm:$0x1] }
 0x24f   : > { %v1223_v42 = vadd.f32 1.0, %v4701_v39  ;;  %v4703_v61 = vpop.eup %4702 }
 0x250   : > { %4706 = vrcp.f32 %v1217_v40  ;;  %v4705_v63 = vpop.eup %4704  ;;  %v1230_v62 = vadd.f32 1.0, %v4703_v61  ;;  %v5443_v40 = vld [vmem:[#allocation5 + $0x4] ss:$16 sps:$4 sm:$0xff]   ;;  %v5447_v61 = vld [vmem:[#allocation5] ss:$16 sps:$4 sm:$0xff]  }
 0x251   : > { %4708 = vrcp.f32 %v1223_v42  ;;  %v5445_v42 = vld [vmem:[#allocation5 + $0xc] ss:$16 sps:$4 sm:$0xff]   ;;  %2017 = vmatprep.subr.bf16.mxu0 %v5443_v40 }
 0x252   : > { %4710 = vrcp.f32 %v1230_v62  ;;  %2058 = vmatprep.subr.bf16.mxu1 %v5445_v42  ;;  %v5461_v62 = vld [vmem:[#allocation5 + $0x28] ss:$16 sps:$4 sm:$0xff]  }
 0x25a   : > { %v4707_v1 = vpop.eup %4706 }
 0x25b   : > { %v4709_v2 = vpop.eup %4708  ;;  %v1235_v58 = vmul.f32 %v4707_v1, %v4705_v63  ;;  %v5449_v63 = vld [vmem:[#allocation5 + $0x8] ss:$16 sps:$4 sm:$0xff]   ;;  %v5455_v1 = vld [vmem:[#allocation5 + $0x24] ss:$16 sps:$4 sm:$0xff]  }
 0x25c   : > { %v1234_v49 = vmul.f32 %v4709_v2, %v5296_v43  ;;  %v4711_v14 = vpop.eup %4710  ;;  %v5457_v2 = vld [vmem:[#allocation5 + $0x2c] ss:$16 sps:$4 sm:$0xff]  }
 0x25e   : > { %v5390_v12 = vadd.f32 %v1235_v58, %v1234_v49  ;;  %v5459_v58 = vld [vmem:[#allocation5 + $0x20] ss:$16 sps:$4 sm:$0xff]   ;;  %v5467_v49 = vld [vmem:[#allocation5 + $0x44] ss:$16 sps:$4 sm:$0xff]  }
 0x260   : > { %4712 = vtanh.f32 %v5390_v12 }
 0x26a   : > { %v4713_v46 = vpop.eup %4712 }
 0x26b   : > { %v1238_v5 = vmul.f32 %v4713_v46, %v4711_v14  ;;  %v5469_v14 = vld [vmem:[#allocation5 + $0x4c] ss:$16 sps:$4 sm:$0xff]   ;;  %v5471_v46 = vld [vmem:[#allocation5 + $0x40] ss:$16 sps:$4 sm:$0xff]  }
 0x26d   : > { %v1241_v60 = vpack.c.bf16 %v1238_v5, %v1238_v5  ;;  %v5473_v5 = vld [vmem:[#allocation5 + $0x48] ss:$16 sps:$4 sm:$0xff]  }
 0x26f   : > { %v1249_v44 = vrot.slane %v1241_v60, %v5300_v59  ;;  %1605 = vmatmul.mubr.bf16.vlgmr.msra.gmra.mrb[24].mxu0 %v1241_v60  ;;  %1646 = vmatmul.mubr.bf16.vlgmr.msra.gmra.mrb[24].mxu1 %v1241_v60  ;;  %v5479_v60 = vld [vmem:[#allocation5 + $0x64] ss:$16 sps:$4 sm:$0xff]  }
 0x270   : > { %2049 = vmatprep.mubr.bf16.mxu0 %v6162_v54  ;;  %2090 = vmatprep.mubr.bf16.mxu1 %v6162_v54 }
 0x271   : > { %v1250_v47 = vcombine.high %v1249_v44, %v1249_v44  ;;  %v1257_v43 = vrot.slane %v1249_v44, %v5300_v59  ;;  %2018 = vmatpush1.bf16.msra.mxu0 %v5447_v61  ;;  %2059 = vmatpush1.bf16.msra.mxu1 %v5449_v63  ;;  %v5481_v44 = vld [vmem:[#allocation5 + $0x6c] ss:$16 sps:$4 sm:$0xff]  }
 0x272   : > { %2019 = vmatprep.subr.bf16.mxu0 %v5455_v1  ;;  %2060 = vmatprep.subr.bf16.mxu1 %v5457_v2 }
 0x273   : > { %v1264_v8 = vrot.slane %v1250_v47, %v5300_v59  ;;  %v1265_v0 = vcombine.high %v1257_v43, %v1257_v43  ;;  %v1268_v50 = vunpack.i.h.s16 %v1257_v43  ;;  %v4227_v15 = vpack.i.b16 %v1257_v43, %v1257_v43  ;;  %v5483_v47 = vld [vmem:[#allocation5 + $0x60] ss:$16 sps:$4 sm:$0xff]   ;;  %v5485_v43 = vld [vmem:[#allocation5 + $0x68] ss:$16 sps:$4 sm:$0xff]  }
 0x275   : > { %v1266_v16 = vcombine.high %v1264_v8, %v1264_v8  ;;  %v1270_v18 = vunpack.i.h.s16 %v1264_v8  ;;  %v1272_v34 = vunpack.i.h.s16 %v1265_v0  ;;  %v1276_v48 = vpack.i.b16 %v1268_v50, %v1268_v50  ;;  %2020 = vmatpush1.bf16.msra.mxu0 %v5459_v58  ;;  %2061 = vmatpush1.bf16.msra.mxu1 %v5461_v62  ;;  %v5495_v50 = vld [vmem:[#allocation5 + $0x80] ss:$16 sps:$4 sm:$0xff]  }
 0x276   : > { %v4228_v52 = vpack.i.b16 %v1264_v8, %v1264_v8  ;;  %v4229_v55 = vpack.i.b16 %v1265_v0, %v1265_v0  ;;  %v1289_v51 = vrot.slane %v4227_v15, %v5309_v56  ;;  %2021 = vmatprep.subr.bf16.mxu0 %v5467_v49  ;;  %2062 = vmatprep.subr.bf16.mxu1 %v5469_v14  ;;  %v5491_v8 = vld [vmem:[#allocation5 + $0x84] ss:$16 sps:$4 sm:$0xff]   ;;  %v5493_v0 = vld [vmem:[#allocation5 + $0x8c] ss:$16 sps:$4 sm:$0xff]   ;;  %v5497_v15 = vld [vmem:[#allocation5 + $0x88] ss:$16 sps:$4 sm:$0xff]  }
 0x277   : > { %v1274_v53 = vunpack.i.h.s16 %v1266_v16  ;;  %v1278_v7 = vpack.i.b16 %v1270_v18, %v1270_v18  ;;  %v1280_v9 = vpack.i.b16 %v1272_v34, %v1272_v34  ;;  %v4230_v17 = vpack.i.b16 %v1266_v16, %v1266_v16  ;;  %v5503_v16 = vld [vmem:[#allocation5 + $0xa4] ss:$16 sps:$4 sm:$0xff]   ;;  %v5505_v18 = vld [vmem:[#allocation5 + $0xac] ss:$16 sps:$4 sm:$0xff]   ;;  %v5507_v34 = vld [vmem:[#allocation5 + $0xa0] ss:$16 sps:$4 sm:$0xff]  }
 0x278   : > { %v1296_v57 = vrot.slane %v1276_v48, %v5309_v56  ;;  %v1303_v11 = vrot.slane %v4228_v52, %v5309_v56  ;;  %v1317_v19 = vrot.slane %v4229_v55, %v5309_v56  ;;  %v1350_v13 = vsel %vm5399_vm5, %v1289_v51, %v1349_v3  ;;  %v5509_v48 = vld [vmem:[#allocation5 + $0xa8] ss:$16 sps:$4 sm:$0xff]   ;;  %v5517_v52 = vld [vmem:[#allocation5 + $0xcc] ss:$16 sps:$4 sm:$0xff]   ;;  %v5519_v55 = vld [vmem:[#allocation5 + $0xc0] ss:$16 sps:$4 sm:$0xff]  }
 0x279   : > { %v1282_v45 = vpack.i.b16 %v1274_v53, %v1274_v53  ;;  %v1310_v20 = vrot.slane %v1278_v7, %v5309_v56  ;;  %v1324_v21 = vrot.slane %v1280_v9, %v5309_v56  ;;  %v1331_v22 = vrot.slane %v4230_v17, %v5309_v56  ;;  %1351 = vst [vmem:[%s5035_s7] sm:$0x1] %v1350_v13  ;;  %v5521_v51 = vld [vmem:[#allocation5 + $0xc8] ss:$16 sps:$4 sm:$0xff]   ;;  %v5527_v53 = vld [vmem:[#allocation5 + $0xe4] ss:$16 sps:$4 sm:$0xff]  }
 0x27a   : > { %v1353_v27 = vsel %vm5399_vm5, %v1296_v57, %v1352_v23  ;;  %v1356_v28 = vsel %vm5399_vm5, %v1303_v11, %v1355_v24  ;;  %v1362_v30 = vsel %vm5399_vm5, %v1317_v19, %v1361_v25  ;;  %2022 = vmatpush1.bf16.msra.mxu0 %v5471_v46  ;;  %2063 = vmatpush1.bf16.msra.mxu1 %v5473_v5  ;;  %v5529_v7 = vld [vmem:[#allocation5 + $0xec] ss:$16 sps:$4 sm:$0xff]   ;;  %v5531_v9 = vld [vmem:[#allocation5 + $0xe0] ss:$16 sps:$4 sm:$0xff]   ;;  %v5533_v17 = vld [vmem:[#allocation5 + $0xe8] ss:$16 sps:$4 sm:$0xff]  }
 0x27b   : > { %v1338_v33 = vrot.slane %v1282_v45, %v5309_v56  ;;  %1354 = vst [vmem:[%s5035_s7 + $0x4] sm:$0x1] %v1353_v27  ;;  %1357 = vst [vmem:[%s5035_s7 + $0x8] sm:$0x1] %v1356_v28  ;;  %v1359_v35 = vsel %vm5399_vm5, %v1310_v20, %v1358_v29  ;;  %v1365_v36 = vsel %vm5399_vm5, %v1324_v21, %v1364_v31  ;;  %2023 = vmatprep.subr.bf16.mxu0 %v5479_v60 }
 0x27c   : > { %1363 = vst [vmem:[%s5035_s7 + $0x10] sm:$0x1] %v1362_v30  ;;  %v1368_v37 = vsel %vm5399_vm5, %v1331_v22, %v1367_v32  ;;  %1360 = vst [vmem:[%s5035_s7 + $0xc] sm:$0x1] %v1359_v35  ;;  %2064 = vmatprep.subr.bf16.mxu1 %v5481_v44 }
 0x27d   : > { %1366 = vst [vmem:[%s5035_s7 + $0x14] sm:$0x1] %v1365_v36  ;;  %1369 = vst [vmem:[%s5035_s7 + $0x18] sm:$0x1] %v1368_v37  ;;  %v1371_v39 = vsel %vm5399_vm5, %v1338_v33, %v1370_v38 }
 0x27e   : > { %1372 = vst [vmem:[%s5035_s7 + $0x1c] sm:$0x1] %v1371_v39  ;;  %2024 = vmatpush1.bf16.msra.mxu0 %v5483_v47  ;;  %2065 = vmatpush1.bf16.msra.mxu1 %v5485_v43 }
 0x27f   : > { %2025 = vmatprep.subr.bf16.mxu0 %v5491_v8  ;;  %2066 = vmatprep.subr.bf16.mxu1 %v5493_v0 }
 0x282   : > { %2026 = vmatpush1.bf16.msra.mxu0 %v5495_v50  ;;  %2067 = vmatpush1.bf16.msra.mxu1 %v5497_v15 }
 0x283   : > { %2027 = vmatprep.subr.bf16.mxu0 %v5503_v16  ;;  %2068 = vmatprep.subr.bf16.mxu1 %v5505_v18 }
 0x286   : > { %2028 = vmatpush1.bf16.msra.mxu0 %v5507_v34  ;;  %2069 = vmatpush1.bf16.msra.mxu1 %v5509_v48 }
 0x287   : > { %2029 = vmatprep.subr.bf16.mxu0 %v5515_v4  ;;  %2070 = vmatprep.subr.bf16.mxu1 %v5517_v52 }
 0x28a   : > { %2030 = vmatpush1.bf16.msra.mxu0 %v5519_v55  ;;  %2071 = vmatpush1.bf16.msra.mxu1 %v5521_v51 }
 0x28b   : > { %2031 = vmatprep.subr.bf16.mxu0 %v5527_v53  ;;  %2072 = vmatprep.subr.bf16.mxu1 %v5529_v7 }
 0x28e   : > { %2032 = vmatpush1.bf16.msra.mxu0 %v5531_v9  ;;  %2073 = vmatpush1.bf16.msra.mxu1 %v5533_v17 }
 0x28f   : > { %2461 = vmatprep.subr.bf16.mxu0 %v5443_v40  ;;  %2502 = vmatprep.subr.bf16.mxu1 %v5445_v42 }
 0x342   : > { %v1606_v3 = vpop.f32.mrb[24].mxu0  ;;  %v1647_v57 = vpop.f32.mrb[24].mxu1 }
 0x343   : > { %v1654_v11 = vadd.f32 %v1606_v3, %v5232_v6  ;;  %v1656_v19 = vadd.f32 %v1647_v57, %v5235_v10  ;;  %v1608_v13 = vpop.f32.mrb[25].mxu0  ;;  %v1649_v45 = vpop.f32.mrb[25].mxu1 }
 0x344   : > { %v1655_v20 = vadd.f32 %v1608_v13, %v5237_v26  ;;  %v1657_v21 = vadd.f32 %v1649_v45, %v5240_v41  ;;  %v1610_v22 = vpop.f32.mrb[26].mxu0  ;;  %v1651_v23 = vpop.f32.mrb[26].mxu1 }
 0x345   : > { %v4263_v24 = vmul.f32 -1.442695, %v1654_v11  ;;  %v1611_v25 = vpop.f32.mrb[27].mxu0  ;;  %v1652_v27 = vpop.f32.mrb[27].mxu1 }
 0x346   : > { %v4264_v28 = vmul.f32 -1.442695, %v1655_v20  ;;  %v4265_v29 = vmul.f32 -1.442695, %v1657_v21 }
 0x347   : > { %4714 = vpow2.f32 %v4263_v24 }
 0x348   : > { %4716 = vpow2.f32 %v4264_v28 }
 0x349   : > { %4718 = vpow2.f32 %v4265_v29  ;;  %v1794_v29 = vld [vmem:[%s5035_s7] sm:$0x2] }
 0x34a   : > { %4720 = vtanh.f32 %v1656_v19 }
 0x351   : > { %v4715_v30 = vpop.eup %4714 }
 0x352   : > { %v4717_v31 = vpop.eup %4716  ;;  %v1661_v6 = vadd.f32 1.0, %v4715_v30 }
 0x353   : > { %v1667_v10 = vadd.f32 1.0, %v4717_v31  ;;  %v4719_v26 = vpop.eup %4718 }
 0x354   : > { %4722 = vrcp.f32 %v1661_v6  ;;  %v4721_v32 = vpop.eup %4720  ;;  %v1674_v36 = vadd.f32 1.0, %v4719_v26 }
 0x355   : > { %4724 = vrcp.f32 %v1667_v10 }
 0x356   : > { %4726 = vrcp.f32 %v1674_v36  ;;  %v1806_v36 = vld [vmem:[%s5035_s7 + $0x10] sm:$0x2] }
 0x35e   : > { %v4723_v41 = vpop.eup %4722 }
 0x35f   : > { %v4725_v33 = vpop.eup %4724  ;;  %v1679_v35 = vmul.f32 %v4723_v41, %v4721_v32 }
 0x360   : > { %v1678_v37 = vmul.f32 %v4725_v33, %v5390_v12  ;;  %v4727_v39 = vpop.eup %4726  ;;  %v1797_v33 = vld [vmem:[%s5035_s7 + $0x4] sm:$0x2] }
 0x362   : > { %v5546_v38 = vadd.f32 %v1679_v35, %v1678_v37  ;;  %v1800_v35 = vld [vmem:[%s5035_s7 + $0x8] sm:$0x2] }
 0x364   : > { %4728 = vtanh.f32 %v5546_v38 }
 0x36e   : > { %v4729_v3 = vpop.eup %4728 }
 0x36f   : > { %v1682_v57 = vmul.f32 %v4729_v3, %v4727_v39 }
 0x371   : > { %v1685_v11 = vpack.c.bf16 %v1682_v57, %v1682_v57 }
 0x373   : > { %v1693_v19 = vrot.slane %v1685_v11, %v5300_v59  ;;  %2050 = vmatmul.mubr.bf16.vlgmr.msra.gmra.mrb[28].mxu0 %v1685_v11  ;;  %2091 = vmatmul.mubr.bf16.vlgmr.msra.gmra.mrb[28].mxu1 %v1685_v11  ;;  %v1803_v11 = vld [vmem:[%s5035_s7 + $0xc] sm:$0x2] }
 0x374   : > { %2462 = vmatpush1.bf16.msra.mxu0 %v5447_v61  ;;  %2503 = vmatpush1.bf16.msra.mxu1 %v5449_v63 }
 0x375   : > { %v1694_v13 = vcombine.high %v1693_v19, %v1693_v19  ;;  %v1701_v12 = vrot.slane %v1693_v19, %v5300_v59  ;;  %2463 = vmatprep.subr.bf16.mxu0 %v5455_v1  ;;  %2504 = vmatprep.subr.bf16.mxu1 %v5457_v2  ;;  %v1809_v19 = vld [vmem:[%s5035_s7 + $0x14] sm:$0x2] }
 0x376   : > { %2493 = vmatprep.mubr.bf16.mxu0 %v6162_v54  ;;  %2534 = vmatprep.mubr.bf16.mxu1 %v6162_v54 }
 0x377   : > { %v1708_v45 = vrot.slane %v1694_v13, %v5300_v59  ;;  %v1709_v20 = vcombine.high %v1701_v12, %v1701_v12  ;;  %v1712_v21 = vunpack.i.h.s16 %v1701_v12  ;;  %v4266_v22 = vpack.i.b16 %v1701_v12, %v1701_v12  ;;  %v1812_v13 = vld [vmem:[%s5035_s7 + $0x18] sm:$0x2] }
 0x378   : > { %2464 = vmatpush1.bf16.msra.mxu0 %v5459_v58  ;;  %2505 = vmatpush1.bf16.msra.mxu1 %v5461_v62 }
 0x379   : > { %v1710_v23 = vcombine.high %v1708_v45, %v1708_v45  ;;  %v1714_v24 = vunpack.i.h.s16 %v1708_v45  ;;  %v1716_v25 = vunpack.i.h.s16 %v1709_v20  ;;  %v1720_v27 = vpack.i.b16 %v1712_v21, %v1712_v21  ;;  %2465 = vmatprep.subr.bf16.mxu0 %v5467_v49  ;;  %2506 = vmatprep.subr.bf16.mxu1 %v5469_v14 }
 0x37a   : > { %v4267_v30 = vpack.i.b16 %v1708_v45, %v1708_v45  ;;  %v4268_v31 = vpack.i.b16 %v1709_v20, %v1709_v20  ;;  %v1733_v6 = vrot.slane %v4266_v22, %v5309_v56 }
 0x37b   : > { %v1718_v10 = vunpack.i.h.s16 %v1710_v23  ;;  %v1722_v26 = vpack.i.b16 %v1714_v24, %v1714_v24  ;;  %v1724_v32 = vpack.i.b16 %v1716_v25, %v1716_v25  ;;  %v4269_v41 = vpack.i.b16 %v1710_v23, %v1710_v23  ;;  %v1815_v25 = vld [vmem:[%s5035_s7 + $0x1c] sm:$0x2] }
 0x37c   : > { %v1740_v37 = vrot.slane %v1720_v27, %v5309_v56  ;;  %v1747_v39 = vrot.slane %v4267_v30, %v5309_v56  ;;  %v1761_v3 = vrot.slane %v4268_v31, %v5309_v56  ;;  %v1795_v57 = vsel %vm5561_vm8, %v1733_v6, %v1794_v29  ;;  %2466 = vmatpush1.bf16.msra.mxu0 %v5471_v46 }
 0x37d   : > { %v1726_v12 = vpack.i.b16 %v1718_v10, %v1718_v10  ;;  %v1754_v45 = vrot.slane %v1722_v26, %v5309_v56  ;;  %v1768_v20 = vrot.slane %v1724_v32, %v5309_v56  ;;  %v1775_v21 = vrot.slane %v4269_v41, %v5309_v56  ;;  %1796 = vst [vmem:[%s5035_s7] sm:$0x2] %v1795_v57  ;;  %v6169_v26 = vld [vmem:[#allocation11_spill] sm:$0xff]  ;;  %v6170_v41 = vld [vmem:[#allocation12_spill] sm:$0xff] }
 0x37e   : > { %2507 = vmatpush1.bf16.msra.mxu1 %v5473_v5  ;;  %v1798_v22 = vsel %vm5561_vm8, %v1740_v37, %v1797_v33  ;;  %v1801_v23 = vsel %vm5561_vm8, %v1747_v39, %v1800_v35  ;;  %v1807_v24 = vsel %vm5561_vm8, %v1761_v3, %v1806_v36  ;;  %2467 = vmatprep.subr.bf16.mxu0 %v5479_v60  ;;  %v6171_v37 = vld [vmem:[#allocation13_spill] sm:$0xff]  ;;  %v6172_v3 = vld [vmem:[#allocation14_spill] sm:$0xff] }
 0x37f   : > { %2508 = vmatprep.subr.bf16.mxu1 %v5481_v44  ;;  %v1782_v27 = vrot.slane %v1726_v12, %v5309_v56  ;;  %1799 = vst [vmem:[%s5035_s7 + $0x4] sm:$0x2] %v1798_v22  ;;  %1802 = vst [vmem:[%s5035_s7 + $0x8] sm:$0x2] %v1801_v23  ;;  %v1804_v29 = vsel %vm5561_vm8, %v1754_v45, %v1803_v11  ;;  %v1810_v30 = vsel %vm5561_vm8, %v1768_v20, %v1809_v19 }
 0x380   : > { %1808 = vst [vmem:[%s5035_s7 + $0x10] sm:$0x2] %v1807_v24  ;;  %v1813_v31 = vsel %vm5561_vm8, %v1775_v21, %v1812_v13  ;;  %1805 = vst [vmem:[%s5035_s7 + $0xc] sm:$0x2] %v1804_v29  ;;  %2468 = vmatpush1.bf16.msra.mxu0 %v5483_v47 }
 0x381   : > { %1811 = vst [vmem:[%s5035_s7 + $0x14] sm:$0x2] %v1810_v30  ;;  %1814 = vst [vmem:[%s5035_s7 + $0x18] sm:$0x2] %v1813_v31  ;;  %v1816_v6 = vsel %vm5561_vm8, %v1782_v27, %v1815_v25  ;;  %2469 = vmatprep.subr.bf16.mxu0 %v5491_v8 }
 0x382   : > { %2509 = vmatpush1.bf16.msra.mxu1 %v5485_v43  ;;  %1817 = vst [vmem:[%s5035_s7 + $0x1c] sm:$0x2] %v1816_v6 }
 0x383   : > { %2510 = vmatprep.subr.bf16.mxu1 %v5493_v0 }
 0x384   : > { %2470 = vmatpush1.bf16.msra.mxu0 %v5495_v50 }
 0x385   : > { %2471 = vmatprep.subr.bf16.mxu0 %v5503_v16 }
 0x386   : > { %2511 = vmatpush1.bf16.msra.mxu1 %v5497_v15 }
 0x387   : > { %2512 = vmatprep.subr.bf16.mxu1 %v5505_v18 }
 0x388   : > { %2472 = vmatpush1.bf16.msra.mxu0 %v5507_v34 }
 0x389   : > { %2473 = vmatprep.subr.bf16.mxu0 %v5515_v4 }
 0x38a   : > { %2513 = vmatpush1.bf16.msra.mxu1 %v5509_v48 }
 0x38b   : > { %2514 = vmatprep.subr.bf16.mxu1 %v5517_v52 }
 0x38c   : > { %2474 = vmatpush1.bf16.msra.mxu0 %v5519_v55 }
 0x38d   : > { %2475 = vmatprep.subr.bf16.mxu0 %v5527_v53 }
 0x38e   : > { %2515 = vmatpush1.bf16.msra.mxu1 %v5521_v51 }
 0x38f   : > { %2516 = vmatprep.subr.bf16.mxu1 %v5529_v7 }
 0x390   : > { %2476 = vmatpush1.bf16.msra.mxu0 %v5531_v9 }
 0x391   : > { %2906 = vmatprep.subr.bf16.mxu0 %v5443_v40 }
 0x392   : > { %2517 = vmatpush1.bf16.msra.mxu1 %v5533_v17 }
 0x393   : > { %2947 = vmatprep.subr.bf16.mxu1 %v5445_v42 }
 0x446   : > { %v2051_v28 = vpop.f32.mrb[28].mxu0  ;;  %v2092_v10 = vpop.f32.mrb[28].mxu1 }
 0x447   : > { %v2099_v32 = vadd.f32 %v2051_v28, %v6169_v26  ;;  %v2101_v33 = vadd.f32 %v2092_v10, %v6170_v41  ;;  %v2053_v35 = vpop.f32.mrb[29].mxu0  ;;  %v2094_v36 = vpop.f32.mrb[29].mxu1 }
 0x448   : > { %v2100_v39 = vadd.f32 %v2053_v35, %v6171_v37  ;;  %v2102_v57 = vadd.f32 %v2094_v36, %v6172_v3  ;;  %v2055_v11 = vpop.f32.mrb[30].mxu0  ;;  %v2096_v19 = vpop.f32.mrb[30].mxu1 }
 0x449   : > { %v4302_v13 = vmul.f32 -1.442695, %v2099_v32  ;;  %v2056_v12 = vpop.f32.mrb[31].mxu0  ;;  %v2097_v45 = vpop.f32.mrb[31].mxu1 }
 0x44a   : > { %v4303_v40 = vmul.f32 -1.442695, %v2100_v39  ;;  %v4304_v42 = vmul.f32 -1.442695, %v2102_v57 }
 0x44b   : > { %4730 = vpow2.f32 %v4302_v13 }
 0x44c   : > { %4732 = vpow2.f32 %v4303_v40  ;;  %v2238_v40 = vld [vmem:[%s5035_s7] sm:$0x2] }
 0x44d   : > { %4734 = vpow2.f32 %v4304_v42 }
 0x44e   : > { %4736 = vtanh.f32 %v2101_v33 }
 0x455   : > { %v4731_v20 = vpop.eup %4730 }
 0x456   : > { %v4733_v21 = vpop.eup %4732  ;;  %v2106_v22 = vadd.f32 1.0, %v4731_v20 }
 0x457   : > { %v2112_v23 = vadd.f32 1.0, %v4733_v21  ;;  %v4735_v24 = vpop.eup %4734 }
 0x458   : > { %4738 = vrcp.f32 %v2106_v22  ;;  %v4737_v25 = vpop.eup %4736  ;;  %v2119_v31 = vadd.f32 1.0, %v4735_v24 }
 0x459   : > { %4740 = vrcp.f32 %v2112_v23 }
 0x45a   : > { %4742 = vrcp.f32 %v2119_v31  ;;  %v2247_v31 = vld [vmem:[%s5035_s7 + $0xc] sm:$0x2] }
 0x462   : > { %v4739_v27 = vpop.eup %4738 }
 0x463   : > { %v4741_v29 = vpop.eup %4740  ;;  %v2124_v30 = vmul.f32 %v4739_v27, %v4737_v25  ;;  %v2241_v25 = vld [vmem:[%s5035_s7 + $0x4] sm:$0x2]  ;;  %v2244_v27 = vld [vmem:[%s5035_s7 + $0x8] sm:$0x2] }
 0x464   : > { %v2123_v6 = vmul.f32 %v4741_v29, %v5546_v38  ;;  %v4743_v10 = vpop.eup %4742  ;;  %v2250_v29 = vld [vmem:[%s5035_s7 + $0x10] sm:$0x2] }
 0x466   : > { %v5636_v28 = vadd.f32 %v2124_v30, %v2123_v6 }
 0x468   : > { %4744 = vtanh.f32 %v5636_v28 }
 0x472   : > { %v4745_v26 = vpop.eup %4744 }
 0x473   : > { %v2127_v32 = vmul.f32 %v4745_v26, %v4743_v10  ;;  %v2253_v10 = vld [vmem:[%s5035_s7 + $0x14] sm:$0x2]  ;;  %v2256_v26 = vld [vmem:[%s5035_s7 + $0x18] sm:$0x2] }
 0x475   : > { %v2130_v41 = vpack.c.bf16 %v2127_v32, %v2127_v32 }
 0x477   : > { %v2138_v33 = vrot.slane %v2130_v41, %v5300_v59  ;;  %2494 = vmatmul.mubr.bf16.vlgmr.msra.gmra.mrb[32].mxu0 %v2130_v41  ;;  %2535 = vmatmul.mubr.bf16.vlgmr.msra.gmra.mrb[32].mxu1 %v2130_v41 }
 0x478   : > { %2907 = vmatpush1.bf16.msra.mxu0 %v5447_v61  ;;  %2948 = vmatpush1.bf16.msra.mxu1 %v5449_v63 }
 0x479   : > { %v2139_v35 = vcombine.high %v2138_v33, %v2138_v33  ;;  %v2146_v38 = vrot.slane %v2138_v33, %v5300_v59  ;;  %2908 = vmatprep.subr.bf16.mxu0 %v5455_v1  ;;  %2949 = vmatprep.subr.bf16.mxu1 %v5457_v2 }
 0x47a   : > { %2938 = vmatprep.mubr.bf16.mxu0 %v6162_v54  ;;  %2979 = vmatprep.mubr.bf16.mxu1 %v6162_v54 }
 0x47b   : > { %v2153_v36 = vrot.slane %v2139_v35, %v5300_v59  ;;  %v2154_v37 = vcombine.high %v2146_v38, %v2146_v38  ;;  %v2157_v39 = vunpack.i.h.s16 %v2146_v38  ;;  %v4305_v3 = vpack.i.b16 %v2146_v38, %v2146_v38 }
 0x47c   : > { %2909 = vmatpush1.bf16.msra.mxu0 %v5459_v58  ;;  %2950 = vmatpush1.bf16.msra.mxu1 %v5461_v62 }
 0x47d   : > { %v2155_v61 = vcombine.high %v2153_v36, %v2153_v36  ;;  %v2159_v63 = vunpack.i.h.s16 %v2153_v36  ;;  %v2161_v1 = vunpack.i.h.s16 %v2154_v37  ;;  %v2165_v57 = vpack.i.b16 %v2157_v39, %v2157_v39  ;;  %2910 = vmatprep.subr.bf16.mxu0 %v5467_v49  ;;  %2951 = vmatprep.subr.bf16.mxu1 %v5469_v14 }
 0x47e   : > { %v4306_v11 = vpack.i.b16 %v2153_v36, %v2153_v36  ;;  %v4307_v19 = vpack.i.b16 %v2154_v37, %v2154_v37  ;;  %v2178_v58 = vrot.slane %v4305_v3, %v5309_v56 }
 0x47f   : > { %v2163_v62 = vunpack.i.h.s16 %v2155_v61  ;;  %v2167_v13 = vpack.i.b16 %v2159_v63, %v2159_v63  ;;  %v2169_v12 = vpack.i.b16 %v2161_v1, %v2161_v1  ;;  %v4308_v45 = vpack.i.b16 %v2155_v61, %v2155_v61 }
 0x480   : > { %v2185_v42 = vrot.slane %v2165_v57, %v5309_v56  ;;  %v2192_v49 = vrot.slane %v4306_v11, %v5309_v56  ;;  %v2206_v14 = vrot.slane %v4307_v19, %v5309_v56  ;;  %v2239_v20 = vsel %vm5651_vm10, %v2178_v58, %v2238_v40  ;;  %2911 = vmatpush1.bf16.msra.mxu0 %v5471_v46 }
 0x481   : > { %v2171_v21 = vpack.i.b16 %v2163_v62, %v2163_v62  ;;  %v2199_v22 = vrot.slane %v2167_v13, %v5309_v56  ;;  %v2213_v23 = vrot.slane %v2169_v12, %v5309_v56  ;;  %v2220_v24 = vrot.slane %v4308_v45, %v5309_v56  ;;  %2240 = vst [vmem:[%s5035_s7] sm:$0x2] %v2239_v20 }
 0x482   : > { %2952 = vmatpush1.bf16.msra.mxu1 %v5473_v5  ;;  %v2242_v46 = vsel %vm5651_vm10, %v2185_v42, %v2241_v25  ;;  %v2245_v30 = vsel %vm5651_vm10, %v2192_v49, %v2244_v27  ;;  %v2251_v6 = vsel %vm5651_vm10, %v2206_v14, %v2250_v29  ;;  %2912 = vmatprep.subr.bf16.mxu0 %v5479_v60  ;;  %v2259_v60 = vld [vmem:[%s5035_s7 + $0x1c] sm:$0x2]  ;;  %v2683_v27 = vld [vmem:[%s5035_s7] sm:$0x4]  ;;  %v5861_v25 = vld [vmem:[#allocation5 + $0xe4] ss:$16 sps:$4 sm:$0xff]  }
 0x483   : > { %2953 = vmatprep.subr.bf16.mxu1 %v5481_v44  ;;  %v2227_v5 = vrot.slane %v2171_v21, %v5309_v56  ;;  %2243 = vst [vmem:[%s5035_s7 + $0x4] sm:$0x2] %v2242_v46  ;;  %2246 = vst [vmem:[%s5035_s7 + $0x8] sm:$0x2] %v2245_v30  ;;  %v2248_v32 = vsel %vm5651_vm10, %v2199_v22, %v2247_v31  ;;  %v2254_v41 = vsel %vm5651_vm10, %v2213_v23, %v2253_v10 }
 0x484   : > { %2252 = vst [vmem:[%s5035_s7 + $0x10] sm:$0x2] %v2251_v6  ;;  %v2257_v33 = vsel %vm5651_vm10, %v2220_v24, %v2256_v26  ;;  %2249 = vst [vmem:[%s5035_s7 + $0xc] sm:$0x2] %v2248_v32  ;;  %2913 = vmatpush1.bf16.msra.mxu0 %v5483_v47  ;;  %v2689_v32 = vld [vmem:[%s5035_s7 + $0x8] sm:$0x4] }
 0x485   : > { %2255 = vst [vmem:[%s5035_s7 + $0x14] sm:$0x2] %v2254_v41  ;;  %2258 = vst [vmem:[%s5035_s7 + $0x18] sm:$0x2] %v2257_v33  ;;  %v2260_v44 = vsel %vm5651_vm10, %v2227_v5, %v2259_v60  ;;  %2914 = vmatprep.subr.bf16.mxu0 %v5491_v8  ;;  %v6175_v8 = vld [vmem:[#allocation15_spill] sm:$0xff] }
 0x486   : > { %2954 = vmatpush1.bf16.msra.mxu1 %v5485_v43  ;;  %2261 = vst [vmem:[%s5035_s7 + $0x1c] sm:$0x2] %v2260_v44  ;;  %v2686_v5 = vld [vmem:[%s5035_s7 + $0x4] sm:$0x4]  ;;  %v2695_v41 = vld [vmem:[%s5035_s7 + $0x10] sm:$0x4] }
 0x487   : > { %2955 = vmatprep.subr.bf16.mxu1 %v5493_v0 }
 0x488   : > { %2915 = vmatpush1.bf16.msra.mxu0 %v5495_v50  ;;  %v6176_v50 = vld [vmem:[#allocation16_spill] sm:$0xff] }
 0x489   : > { %2916 = vmatprep.subr.bf16.mxu0 %v5503_v16 }
 0x48a   : > { %2956 = vmatpush1.bf16.msra.mxu1 %v5497_v15 }
 0x48b   : > { %2957 = vmatprep.subr.bf16.mxu1 %v5505_v18 }
 0x48c   : > { %2917 = vmatpush1.bf16.msra.mxu0 %v5507_v34  ;;  %v6177_v34 = vld [vmem:[#allocation17_spill] sm:$0xff] }
 0x48d   : > { %2918 = vmatprep.subr.bf16.mxu0 %v5515_v4  ;;  %v6178_v4 = vld [vmem:[#allocation18_spill] sm:$0xff] }
 0x48e   : > { %2958 = vmatpush1.bf16.msra.mxu1 %v5509_v48 }
 0x48f   : > { %2959 = vmatprep.subr.bf16.mxu1 %v5517_v52 }
 0x490   : > { %2919 = vmatpush1.bf16.msra.mxu0 %v5519_v55 }
 0x491   : > { %2920 = vmatprep.subr.bf16.mxu0 %v5527_v53 }
 0x492   : > { %2960 = vmatpush1.bf16.msra.mxu1 %v5521_v51 }
 0x493   : > { %2961 = vmatprep.subr.bf16.mxu1 %v5529_v7 }
 0x494   : > { %2921 = vmatpush1.bf16.msra.mxu0 %v5531_v9 }
 0x496   : > { %2962 = vmatpush1.bf16.msra.mxu1 %v5533_v17 }
 0x54a   : > { %v2495_v47 = vpop.f32.mrb[32].mxu0  ;;  %v2536_v43 = vpop.f32.mrb[32].mxu1 }
 0x54b   : > { %v2543_v0 = vadd.f32 %v2495_v47, %v6175_v8  ;;  %v2545_v15 = vadd.f32 %v2536_v43, %v6176_v50  ;;  %v2497_v16 = vpop.f32.mrb[33].mxu0  ;;  %v2538_v18 = vpop.f32.mrb[33].mxu1  ;;  %v2692_v43 = vld [vmem:[%s5035_s7 + $0xc] sm:$0x4]  ;;  %v2698_v8 = vld [vmem:[%s5035_s7 + $0x14] sm:$0x4] }
 0x54c   : > { %v2544_v48 = vadd.f32 %v2497_v16, %v6177_v34  ;;  %v2546_v52 = vadd.f32 %v2538_v18, %v6178_v4  ;;  %v2499_v55 = vpop.f32.mrb[34].mxu0  ;;  %v2540_v51 = vpop.f32.mrb[34].mxu1 }
 0x54d   : > { %v4341_v53 = vmul.f32 -1.442695, %v2543_v0  ;;  %v2500_v7 = vpop.f32.mrb[35].mxu0  ;;  %v2541_v35 = vpop.f32.mrb[35].mxu1  ;;  %v2701_v0 = vld [vmem:[%s5035_s7 + $0x18] sm:$0x4] }
 0x54e   : > { %v4342_v9 = vmul.f32 -1.442695, %v2544_v48  ;;  %v4343_v17 = vmul.f32 -1.442695, %v2546_v52  ;;  %v2704_v52 = vld [vmem:[%s5035_s7 + $0x1c] sm:$0x4] }
 0x54f   : > { %4746 = vpow2.f32 %v4341_v53 }
 0x550   : > { %4748 = vpow2.f32 %v4342_v9  ;;  %v5777_v9 = vld [vmem:[#allocation5 + $0x4] ss:$16 sps:$4 sm:$0xff]  }
 0x551   : > { %4750 = vpow2.f32 %v4343_v17  ;;  %v5779_v17 = vld [vmem:[#allocation5 + $0xc] ss:$16 sps:$4 sm:$0xff]   ;;  %3350 = vmatprep.subr.bf16.mxu0 %v5777_v9 }
 0x552   : > { %4752 = vtanh.f32 %v2545_v15  ;;  %3391 = vmatprep.subr.bf16.mxu1 %v5779_v17 }
 0x559   : > { %v4747_v38 = vpop.eup %4746 }
 0x55a   : > { %v4749_v36 = vpop.eup %4748  ;;  %v2550_v37 = vadd.f32 1.0, %v4747_v38  ;;  %v5781_v38 = vld [vmem:[#allocation5] ss:$16 sps:$4 sm:$0xff]  }
 0x55b   : > { %v2556_v39 = vadd.f32 1.0, %v4749_v36  ;;  %v4751_v3 = vpop.eup %4750  ;;  %v5783_v36 = vld [vmem:[#allocation5 + $0x8] ss:$16 sps:$4 sm:$0xff]  }
 0x55c   : > { %4754 = vrcp.f32 %v2550_v37  ;;  %v4753_v61 = vpop.eup %4752  ;;  %v2563_v2 = vadd.f32 1.0, %v4751_v3  ;;  %v5789_v37 = vld [vmem:[#allocation5 + $0x24] ss:$16 sps:$4 sm:$0xff]   ;;  %v5793_v3 = vld [vmem:[#allocation5 + $0x20] ss:$16 sps:$4 sm:$0xff]  }
 0x55d   : > { %4756 = vrcp.f32 %v2556_v39  ;;  %v5791_v39 = vld [vmem:[#allocation5 + $0x2c] ss:$16 sps:$4 sm:$0xff]  }
 0x55e   : > { %4758 = vrcp.f32 %v2563_v2  ;;  %v5807_v2 = vld [vmem:[#allocation5 + $0x48] ss:$16 sps:$4 sm:$0xff]  }
 0x566   : > { %v4755_v63 = vpop.eup %4754 }
 0x567   : > { %v4757_v1 = vpop.eup %4756  ;;  %v2568_v57 = vmul.f32 %v4755_v63, %v4753_v61  ;;  %v5795_v61 = vld [vmem:[#allocation5 + $0x28] ss:$16 sps:$4 sm:$0xff]   ;;  %v5801_v63 = vld [vmem:[#allocation5 + $0x44] ss:$16 sps:$4 sm:$0xff]  }
 0x568   : > { %v2567_v11 = vmul.f32 %v4757_v1, %v5636_v28  ;;  %v4759_v58 = vpop.eup %4758  ;;  %v5803_v1 = vld [vmem:[#allocation5 + $0x4c] ss:$16 sps:$4 sm:$0xff]  }
 0x56a   : > { %v5724_v19 = vadd.f32 %v2568_v57, %v2567_v11  ;;  %v5805_v57 = vld [vmem:[#allocation5 + $0x40] ss:$16 sps:$4 sm:$0xff]   ;;  %v5813_v11 = vld [vmem:[#allocation5 + $0x64] ss:$16 sps:$4 sm:$0xff]  }
 0x56c   : > { %4760 = vtanh.f32 %v5724_v19 }
 0x576   : > { %v4761_v62 = vpop.eup %4760 }
 0x577   : > { %v2571_v13 = vmul.f32 %v4761_v62, %v4759_v58  ;;  %v5815_v58 = vld [vmem:[#allocation5 + $0x6c] ss:$16 sps:$4 sm:$0xff]   ;;  %v5817_v62 = vld [vmem:[#allocation5 + $0x60] ss:$16 sps:$4 sm:$0xff]  }
 0x579   : > { %v2574_v12 = vpack.c.bf16 %v2571_v13, %v2571_v13  ;;  %v5819_v13 = vld [vmem:[#allocation5 + $0x68] ss:$16 sps:$4 sm:$0xff]  }
 0x57b   : > { %v2582_v45 = vrot.slane %v2574_v12, %v5300_v59  ;;  %2939 = vmatmul.mubr.bf16.vlgmr.msra.gmra.mrb[36].mxu0 %v2574_v12  ;;  %2980 = vmatmul.mubr.bf16.vlgmr.msra.gmra.mrb[36].mxu1 %v2574_v12  ;;  %v5825_v12 = vld [vmem:[#allocation5 + $0x84] ss:$16 sps:$4 sm:$0xff]  }
 0x57c   : > { %3382 = vmatprep.mubr.bf16.mxu0 %v6162_v54  ;;  %3423 = vmatprep.mubr.bf16.mxu1 %v6162_v54 }
 0x57d   : > { %v2583_v40 = vcombine.high %v2582_v45, %v2582_v45  ;;  %v2590_v28 = vrot.slane %v2582_v45, %v5300_v59  ;;  %3351 = vmatpush1.bf16.msra.mxu0 %v5781_v38  ;;  %3392 = vmatpush1.bf16.msra.mxu1 %v5783_v36  ;;  %v5827_v45 = vld [vmem:[#allocation5 + $0x8c] ss:$16 sps:$4 sm:$0xff]  }
 0x57e   : > { %3352 = vmatprep.subr.bf16.mxu0 %v5789_v37  ;;  %3393 = vmatprep.subr.bf16.mxu1 %v5791_v39 }
 0x57f   : > { %v2597_v42 = vrot.slane %v2583_v40, %v5300_v59  ;;  %v2598_v49 = vcombine.high %v2590_v28, %v2590_v28  ;;  %v2601_v14 = vunpack.i.h.s16 %v2590_v28  ;;  %v4344_v20 = vpack.i.b16 %v2590_v28, %v2590_v28  ;;  %v5829_v40 = vld [vmem:[#allocation5 + $0x80] ss:$16 sps:$4 sm:$0xff]   ;;  %v5831_v28 = vld [vmem:[#allocation5 + $0x88] ss:$16 sps:$4 sm:$0xff]  }
 0x581   : > { %v2599_v21 = vcombine.high %v2597_v42, %v2597_v42  ;;  %v2603_v22 = vunpack.i.h.s16 %v2597_v42  ;;  %v2605_v23 = vunpack.i.h.s16 %v2598_v49  ;;  %v2609_v24 = vpack.i.b16 %v2601_v14, %v2601_v14  ;;  %3353 = vmatpush1.bf16.msra.mxu0 %v5793_v3  ;;  %3394 = vmatpush1.bf16.msra.mxu1 %v5795_v61  ;;  %v5841_v14 = vld [vmem:[#allocation5 + $0xa0] ss:$16 sps:$4 sm:$0xff]  }
 0x582   : > { %v4345_v29 = vpack.i.b16 %v2597_v42, %v2597_v42  ;;  %v4346_v46 = vpack.i.b16 %v2598_v49, %v2598_v49  ;;  %v2622_v30 = vrot.slane %v4344_v20, %v5309_v56  ;;  %3354 = vmatprep.subr.bf16.mxu0 %v5801_v63  ;;  %3395 = vmatprep.subr.bf16.mxu1 %v5803_v1  ;;  %v5837_v42 = vld [vmem:[#allocation5 + $0xa4] ss:$16 sps:$4 sm:$0xff]   ;;  %v5839_v49 = vld [vmem:[#allocation5 + $0xac] ss:$16 sps:$4 sm:$0xff]   ;;  %v5843_v20 = vld [vmem:[#allocation5 + $0xa8] ss:$16 sps:$4 sm:$0xff]  }
 0x583   : > { %v2607_v31 = vunpack.i.h.s16 %v2599_v21  ;;  %v2611_v6 = vpack.i.b16 %v2603_v22, %v2603_v22  ;;  %v2613_v10 = vpack.i.b16 %v2605_v23, %v2605_v23  ;;  %v4347_v26 = vpack.i.b16 %v2599_v21, %v2599_v21  ;;  %v5849_v21 = vld [vmem:[#allocation5 + $0xc4] ss:$16 sps:$4 sm:$0xff]   ;;  %v5851_v22 = vld [vmem:[#allocation5 + $0xcc] ss:$16 sps:$4 sm:$0xff]   ;;  %v5853_v23 = vld [vmem:[#allocation5 + $0xc0] ss:$16 sps:$4 sm:$0xff]  }
 0x584   : > { %v2629_v33 = vrot.slane %v2609_v24, %v5309_v56  ;;  %v2636_v60 = vrot.slane %v4345_v29, %v5309_v56  ;;  %v2650_v44 = vrot.slane %v4346_v46, %v5309_v56  ;;  %v2684_v47 = vsel %vm5733_vm13, %v2622_v30, %v2683_v27  ;;  %v5855_v24 = vld [vmem:[#allocation5 + $0xc8] ss:$16 sps:$4 sm:$0xff]   ;;  %v5863_v27 = vld [vmem:[#allocation5 + $0xec] ss:$16 sps:$4 sm:$0xff]   ;;  %v5865_v29 = vld [vmem:[#allocation5 + $0xe0] ss:$16 sps:$4 sm:$0xff]  }
 0x585   : > { %v2615_v50 = vpack.i.b16 %v2607_v31, %v2607_v31  ;;  %v2643_v15 = vrot.slane %v2611_v6, %v5309_v56  ;;  %v2657_v16 = vrot.slane %v2613_v10, %v5309_v56  ;;  %v2664_v18 = vrot.slane %v4347_v26, %v5309_v56  ;;  %2685 = vst [vmem:[%s5035_s7] sm:$0x4] %v2684_v47  ;;  %v5867_v46 = vld [vmem:[#allocation5 + $0xe8] ss:$16 sps:$4 sm:$0xff]   ;;  %v6181_v6 = vld [vmem:[#allocation19_spill] sm:$0xff] }
 0x586   : > { %v2687_v34 = vsel %vm5733_vm13, %v2629_v33, %v2686_v5  ;;  %v2690_v48 = vsel %vm5733_vm13, %v2636_v60, %v2689_v32  ;;  %v2696_v4 = vsel %vm5733_vm13, %v2650_v44, %v2695_v41  ;;  %3355 = vmatpush1.bf16.msra.mxu0 %v5805_v57  ;;  %3396 = vmatpush1.bf16.msra.mxu1 %v5807_v2  ;;  %v6182_v26 = vld [vmem:[#allocation20_spill] sm:$0xff]  ;;  %v6183_v33 = vld [vmem:[#allocation21_spill] sm:$0xff]  ;;  %v6184_v44 = vld [vmem:[#allocation22_spill] sm:$0xff] }
 0x587   : > { %v2671_v55 = vrot.slane %v2615_v50, %v5309_v56  ;;  %2688 = vst [vmem:[%s5035_s7 + $0x4] sm:$0x4] %v2687_v34  ;;  %2691 = vst [vmem:[%s5035_s7 + $0x8] sm:$0x4] %v2690_v48  ;;  %v2693_v51 = vsel %vm5733_vm13, %v2643_v15, %v2692_v43  ;;  %v2699_v53 = vsel %vm5733_vm13, %v2657_v16, %v2698_v8  ;;  %3356 = vmatprep.subr.bf16.mxu0 %v5813_v11 }
 0x588   : > { %2697 = vst [vmem:[%s5035_s7 + $0x10] sm:$0x4] %v2696_v4  ;;  %v2702_v7 = vsel %vm5733_vm13, %v2664_v18, %v2701_v0  ;;  %2694 = vst [vmem:[%s5035_s7 + $0xc] sm:$0x4] %v2693_v51  ;;  %3397 = vmatprep.subr.bf16.mxu1 %v5815_v58 }
 0x589   : > { %2700 = vst [vmem:[%s5035_s7 + $0x14] sm:$0x4] %v2699_v53  ;;  %2703 = vst [vmem:[%s5035_s7 + $0x18] sm:$0x4] %v2702_v7  ;;  %v2705_v35 = vsel %vm5733_vm13, %v2671_v55, %v2704_v52 }
 0x58a   : > { %2706 = vst [vmem:[%s5035_s7 + $0x1c] sm:$0x4] %v2705_v35  ;;  %3357 = vmatpush1.bf16.msra.mxu0 %v5817_v62  ;;  %3398 = vmatpush1.bf16.msra.mxu1 %v5819_v13 }
 0x58b   : > { %3358 = vmatprep.subr.bf16.mxu0 %v5825_v12  ;;  %3399 = vmatprep.subr.bf16.mxu1 %v5827_v45 }
 0x58e   : > { %3359 = vmatpush1.bf16.msra.mxu0 %v5829_v40  ;;  %3400 = vmatpush1.bf16.msra.mxu1 %v5831_v28 }
 0x58f   : > { %3360 = vmatprep.subr.bf16.mxu0 %v5837_v42  ;;  %3401 = vmatprep.subr.bf16.mxu1 %v5839_v49 }
 0x592   : > { %3361 = vmatpush1.bf16.msra.mxu0 %v5841_v14  ;;  %3402 = vmatpush1.bf16.msra.mxu1 %v5843_v20 }
 0x593   : > { %3362 = vmatprep.subr.bf16.mxu0 %v5849_v21  ;;  %3403 = vmatprep.subr.bf16.mxu1 %v5851_v22 }
 0x596   : > { %3363 = vmatpush1.bf16.msra.mxu0 %v5853_v23  ;;  %3404 = vmatpush1.bf16.msra.mxu1 %v5855_v24 }
 0x597   : > { %3364 = vmatprep.subr.bf16.mxu0 %v5861_v25  ;;  %3405 = vmatprep.subr.bf16.mxu1 %v5863_v27 }
 0x59a   : > { %3365 = vmatpush1.bf16.msra.mxu0 %v5865_v29  ;;  %3406 = vmatpush1.bf16.msra.mxu1 %v5867_v46 }
 0x59b   : > { %3795 = vmatprep.subr.bf16.mxu0 %v5777_v9  ;;  %3836 = vmatprep.subr.bf16.mxu1 %v5779_v17 }
 0x64e   : > { %v2940_v30 = vpop.f32.mrb[36].mxu0  ;;  %v2981_v31 = vpop.f32.mrb[36].mxu1 }
 0x64f   : > { %v2988_v10 = vadd.f32 %v2940_v30, %v6181_v6  ;;  %v2990_v5 = vadd.f32 %v2981_v31, %v6182_v26  ;;  %v2942_v32 = vpop.f32.mrb[37].mxu0  ;;  %v2983_v41 = vpop.f32.mrb[37].mxu1 }
 0x650   : > { %v2989_v60 = vadd.f32 %v2942_v32, %v6183_v33  ;;  %v2991_v47 = vadd.f32 %v2983_v41, %v6184_v44  ;;  %v2944_v43 = vpop.f32.mrb[38].mxu0  ;;  %v2985_v8 = vpop.f32.mrb[38].mxu1 }
 0x651   : > { %v4380_v0 = vmul.f32 -1.442695, %v2988_v10  ;;  %v2945_v50 = vpop.f32.mrb[39].mxu0  ;;  %v2986_v15 = vpop.f32.mrb[39].mxu1 }
 0x652   : > { %v4381_v16 = vmul.f32 -1.442695, %v2989_v60  ;;  %v4382_v18 = vmul.f32 -1.442695, %v2991_v47  ;;  %v3127_v15 = vld [vmem:[%s5035_s7] sm:$0x4] }
 0x653   : > { %4762 = vpow2.f32 %v4380_v0 }
 0x654   : > { %4764 = vpow2.f32 %v4381_v16 }
 0x655   : > { %4766 = vpow2.f32 %v4382_v18 }
 0x656   : > { %4768 = vtanh.f32 %v2990_v5 }
 0x65d   : > { %v4763_v34 = vpop.eup %4762 }
 0x65e   : > { %v4765_v48 = vpop.eup %4764  ;;  %v2995_v4 = vadd.f32 1.0, %v4763_v34 }
 0x65f   : > { %v3001_v52 = vadd.f32 1.0, %v4765_v48  ;;  %v4767_v55 = vpop.eup %4766 }
 0x660   : > { %4770 = vrcp.f32 %v2995_v4  ;;  %v4769_v51 = vpop.eup %4768  ;;  %v3008_v9 = vadd.f32 1.0, %v4767_v55  ;;  %v3130_v55 = vld [vmem:[%s5035_s7 + $0x4] sm:$0x4] }
 0x661   : > { %4772 = vrcp.f32 %v3001_v52 }
 0x662   : > { %4774 = vrcp.f32 %v3008_v9 }
 0x66a   : > { %v4771_v53 = vpop.eup %4770 }
 0x66b   : > { %v4773_v7 = vpop.eup %4772  ;;  %v3013_v35 = vmul.f32 %v4771_v53, %v4769_v51  ;;  %v3133_v51 = vld [vmem:[%s5035_s7 + $0x8] sm:$0x4]  ;;  %v3139_v53 = vld [vmem:[%s5035_s7 + $0x10] sm:$0x4] }
 0x66c   : > { %v3012_v17 = vmul.f32 %v4773_v7, %v5724_v19  ;;  %v4775_v31 = vpop.eup %4774 }
 0x66e   : > { %v5880_v30 = vadd.f32 %v3013_v35, %v3012_v17  ;;  %v3136_v35 = vld [vmem:[%s5035_s7 + $0xc] sm:$0x4]  ;;  %v3142_v17 = vld [vmem:[%s5035_s7 + $0x14] sm:$0x4] }
 0x670   : > { %4776 = vtanh.f32 %v5880_v30 }
 0x67a   : > { %v4777_v6 = vpop.eup %4776 }
 0x67b   : > { %v3016_v10 = vmul.f32 %v4777_v6, %v4775_v31  ;;  %v3145_v31 = vld [vmem:[%s5035_s7 + $0x18] sm:$0x4] }
 0x67d   : > { %v3019_v26 = vpack.c.bf16 %v3016_v10, %v3016_v10 }
 0x67f   : > { %v3027_v5 = vrot.slane %v3019_v26, %v5300_v59  ;;  %3383 = vmatmul.mubr.bf16.vlgmr.msra.gmra.mrb[40].mxu0 %v3019_v26  ;;  %3424 = vmatmul.mubr.bf16.vlgmr.msra.gmra.mrb[40].mxu1 %v3019_v26 }
 0x680   : > { %3796 = vmatpush1.bf16.msra.mxu0 %v5781_v38  ;;  %3837 = vmatpush1.bf16.msra.mxu1 %v5783_v36 }
 0x681   : > { %v3028_v32 = vcombine.high %v3027_v5, %v3027_v5  ;;  %v3035_v19 = vrot.slane %v3027_v5, %v5300_v59  ;;  %3797 = vmatprep.subr.bf16.mxu0 %v5789_v37  ;;  %3838 = vmatprep.subr.bf16.mxu1 %v5791_v39 }
 0x682   : > { %3827 = vmatprep.mubr.bf16.mxu0 %v6162_v54  ;;  %3868 = vmatprep.mubr.bf16.mxu1 %v6162_v54 }
 0x683   : > { %v3042_v41 = vrot.slane %v3028_v32, %v5300_v59  ;;  %v3043_v33 = vcombine.high %v3035_v19, %v3035_v19  ;;  %v3046_v60 = vunpack.i.h.s16 %v3035_v19  ;;  %v4383_v44 = vpack.i.b16 %v3035_v19, %v3035_v19 }
 0x684   : > { %3798 = vmatpush1.bf16.msra.mxu0 %v5793_v3  ;;  %3839 = vmatpush1.bf16.msra.mxu1 %v5795_v61 }
 0x685   : > { %v3044_v38 = vcombine.high %v3042_v41, %v3042_v41  ;;  %v3048_v36 = vunpack.i.h.s16 %v3042_v41  ;;  %v3050_v37 = vunpack.i.h.s16 %v3043_v33  ;;  %v3054_v47 = vpack.i.b16 %v3046_v60, %v3046_v60  ;;  %3799 = vmatprep.subr.bf16.mxu0 %v5801_v63  ;;  %3840 = vmatprep.subr.bf16.mxu1 %v5803_v1 }
 0x686   : > { %v4384_v54 = vpack.i.b16 %v3042_v41, %v3042_v41  ;;  %v4385_v43 = vpack.i.b16 %v3043_v33, %v3043_v33  ;;  %v3067_v3 = vrot.slane %v4383_v44, %v5309_v56 }
 0x687   : > { %v3052_v61 = vunpack.i.h.s16 %v3044_v38  ;;  %v3056_v8 = vpack.i.b16 %v3048_v36, %v3048_v36  ;;  %v3058_v0 = vpack.i.b16 %v3050_v37, %v3050_v37  ;;  %v4386_v50 = vpack.i.b16 %v3044_v38, %v3044_v38 }
 0x688   : > { %v3074_v16 = vrot.slane %v3054_v47, %v5309_v56  ;;  %v3081_v63 = vrot.slane %v4384_v54, %v5309_v56  ;;  %v3095_v1 = vrot.slane %v4385_v43, %v5309_v56  ;;  %v3128_v18 = vsel %vm5895_vm15, %v3067_v3, %v3127_v15  ;;  %3800 = vmatpush1.bf16.msra.mxu0 %v5805_v57 }
 0x689   : > { %v3060_v34 = vpack.i.b16 %v3052_v61, %v3052_v61  ;;  %v3088_v48 = vrot.slane %v3056_v8, %v5309_v56  ;;  %v3102_v4 = vrot.slane %v3058_v0, %v5309_v56  ;;  %v3109_v52 = vrot.slane %v4386_v50, %v5309_v56  ;;  %3129 = vst [vmem:[%s5035_s7] sm:$0x4] %v3128_v18 }
 0x68a   : > { %3841 = vmatpush1.bf16.msra.mxu1 %v5807_v2  ;;  %v3131_v57 = vsel %vm5895_vm15, %v3074_v16, %v3130_v55  ;;  %v3134_v7 = vsel %vm5895_vm15, %v3081_v63, %v3133_v51  ;;  %v3140_v9 = vsel %vm5895_vm15, %v3095_v1, %v3139_v53  ;;  %3801 = vmatprep.subr.bf16.mxu0 %v5813_v11  ;;  %v3148_v11 = vld [vmem:[%s5035_s7 + $0x1c] sm:$0x4]  ;;  %v3572_v55 = vld [vmem:[%s5035_s7] sm:$0x8] }
 0x68b   : > { %3842 = vmatprep.subr.bf16.mxu1 %v5815_v58  ;;  %v3116_v2 = vrot.slane %v3060_v34, %v5309_v56  ;;  %3132 = vst [vmem:[%s5035_s7 + $0x4] sm:$0x4] %v3131_v57  ;;  %3135 = vst [vmem:[%s5035_s7 + $0x8] sm:$0x4] %v3134_v7  ;;  %v3137_v6 = vsel %vm5895_vm15, %v3088_v48, %v3136_v35  ;;  %v3143_v10 = vsel %vm5895_vm15, %v3102_v4, %v3142_v17 }
 0x68c   : > { %3141 = vst [vmem:[%s5035_s7 + $0x10] sm:$0x4] %v3140_v9  ;;  %v3146_v26 = vsel %vm5895_vm15, %v3109_v52, %v3145_v31  ;;  %3138 = vst [vmem:[%s5035_s7 + $0xc] sm:$0x4] %v3137_v6  ;;  %3802 = vmatpush1.bf16.msra.mxu0 %v5817_v62  ;;  %v3575_v31 = vld [vmem:[%s5035_s7 + $0x4] sm:$0x8] }
 0x68d   : > { %3144 = vst [vmem:[%s5035_s7 + $0x14] sm:$0x4] %v3143_v10  ;;  %3147 = vst [vmem:[%s5035_s7 + $0x18] sm:$0x4] %v3146_v26  ;;  %v3149_v58 = vsel %vm5895_vm15, %v3116_v2, %v3148_v11  ;;  %3803 = vmatprep.subr.bf16.mxu0 %v5825_v12  ;;  %v6187_v12 = vld [vmem:[#allocation23_spill] sm:$0xff] }
 0x68e   : > { %3843 = vmatpush1.bf16.msra.mxu1 %v5819_v13  ;;  %3150 = vst [vmem:[%s5035_s7 + $0x1c] sm:$0x4] %v3149_v58  ;;  %v3578_v2 = vld [vmem:[%s5035_s7 + $0x8] sm:$0x8]  ;;  %v3584_v6 = vld [vmem:[%s5035_s7 + $0x10] sm:$0x8] }
 0x68f   : > { %3844 = vmatprep.subr.bf16.mxu1 %v5827_v45 }
 0x690   : > { %3804 = vmatpush1.bf16.msra.mxu0 %v5829_v40  ;;  %v6188_v40 = vld [vmem:[#allocation24_spill] sm:$0xff] }
 0x691   : > { %3805 = vmatprep.subr.bf16.mxu0 %v5837_v42 }
 0x692   : > { %3845 = vmatpush1.bf16.msra.mxu1 %v5831_v28 }
 0x693   : > { %3846 = vmatprep.subr.bf16.mxu1 %v5839_v49 }
 0x694   : > { %3806 = vmatpush1.bf16.msra.mxu0 %v5841_v14  ;;  %v6189_v14 = vld [vmem:[#allocation25_spill] sm:$0xff] }
 0x695   : > { %3807 = vmatprep.subr.bf16.mxu0 %v5849_v21  ;;  %v6190_v21 = vld [vmem:[#allocation26_spill] sm:$0xff] }
 0x696   : > { %3847 = vmatpush1.bf16.msra.mxu1 %v5843_v20 }
 0x697   : > { %3848 = vmatprep.subr.bf16.mxu1 %v5851_v22 }
 0x698   : > { %3808 = vmatpush1.bf16.msra.mxu0 %v5853_v23 }
 0x699   : > { %3809 = vmatprep.subr.bf16.mxu0 %v5861_v25 }
 0x69a   : > { %3849 = vmatpush1.bf16.msra.mxu1 %v5855_v24 }
 0x69b   : > { %3850 = vmatprep.subr.bf16.mxu1 %v5863_v27 }
 0x69c   : > { %3810 = vmatpush1.bf16.msra.mxu0 %v5865_v29 }
 0x69e   : > { %3851 = vmatpush1.bf16.msra.mxu1 %v5867_v46 }
 0x752   : > { %v3384_v62 = vpop.f32.mrb[40].mxu0  ;;  %v3425_v13 = vpop.f32.mrb[40].mxu1 }
 0x753   : > { %v3432_v45 = vadd.f32 %v3384_v62, %v6187_v12  ;;  %v3434_v28 = vadd.f32 %v3425_v13, %v6188_v40  ;;  %v3386_v42 = vpop.f32.mrb[41].mxu0  ;;  %v3427_v49 = vpop.f32.mrb[41].mxu1  ;;  %v3581_v62 = vld [vmem:[%s5035_s7 + $0xc] sm:$0x8]  ;;  %v3587_v13 = vld [vmem:[%s5035_s7 + $0x14] sm:$0x8] }
 0x754   : > { %v3433_v20 = vadd.f32 %v3386_v42, %v6189_v14  ;;  %v3435_v22 = vadd.f32 %v3427_v49, %v6190_v21  ;;  %v3388_v23 = vpop.f32.mrb[42].mxu0  ;;  %v3429_v24 = vpop.f32.mrb[42].mxu1  ;;  %v3590_v12 = vld [vmem:[%s5035_s7 + $0x18] sm:$0x8]  ;;  %v3593_v21 = vld [vmem:[%s5035_s7 + $0x1c] sm:$0x8] }
 0x755   : > { %v4419_v25 = vmul.f32 -1.442695, %v3432_v45  ;;  %v3389_v27 = vpop.f32.mrb[43].mxu0  ;;  %v3430_v5 = vpop.f32.mrb[43].mxu1 }
 0x756   : > { %v4420_v29 = vmul.f32 -1.442695, %v3433_v20  ;;  %v4421_v46 = vmul.f32 -1.442695, %v3435_v22 }
 0x757   : > { %4778 = vpow2.f32 %v4419_v25 }
 0x758   : > { %4780 = vpow2.f32 %v4420_v29 }
 0x759   : > { %4782 = vpow2.f32 %v4421_v46  ;;  %v6193_v46 = vld [vmem:[#allocation27_spill] sm:$0xff] }
 0x75a   : > { %4784 = vtanh.f32 %v3434_v28 }
 0x761   : > { %v4779_v32 = vpop.eup %4778 }
 0x762   : > { %v4781_v19 = vpop.eup %4780  ;;  %v3439_v41 = vadd.f32 1.0, %v4779_v32 }
 0x763   : > { %v3445_v33 = vadd.f32 1.0, %v4781_v19  ;;  %v4783_v60 = vpop.eup %4782  ;;  %v6194_v19 = vld [vmem:[#allocation28_spill] sm:$0xff] }
 0x764   : > { %4786 = vrcp.f32 %v3439_v41  ;;  %v4785_v44 = vpop.eup %4784  ;;  %v3452_v47 = vadd.f32 1.0, %v4783_v60 }
 0x765   : > { %4788 = vrcp.f32 %v3445_v33 }
 0x766   : > { %4790 = vrcp.f32 %v3452_v47 }
 0x76e   : > { %v4787_v38 = vpop.eup %4786 }
 0x76f   : > { %v4789_v36 = vpop.eup %4788  ;;  %v3457_v37 = vmul.f32 %v4787_v38, %v4785_v44  ;;  %v6195_v44 = vld [vmem:[#allocation29_spill] sm:$0xff] }
 0x770   : > { %v3456_v39 = vmul.f32 %v4789_v36, %v5880_v30  ;;  %v4791_v43 = vpop.eup %4790  ;;  %v6196_v36 = vld [vmem:[#allocation30_spill] sm:$0xff] }
 0x772   : > { %v5968_v54 = vadd.f32 %v3457_v37, %v3456_v39 }
 0x774   : > { %4792 = vtanh.f32 %v5968_v54 }
 0x77e   : > { %v4793_v3 = vpop.eup %4792 }
 0x77f   : > { %v3460_v61 = vmul.f32 %v4793_v3, %v4791_v43 }
 0x781   : > { %v3463_v8 = vpack.c.bf16 %v3460_v61, %v3460_v61 }
 0x783   : > { %v3471_v0 = vrot.slane %v3463_v8, %v5300_v59  ;;  %3828 = vmatmul.mubr.bf16.vlgmr.msra.gmra.mrb[44].mxu0 %v3463_v8  ;;  %3869 = vmatmul.mubr.bf16.vlgmr.msra.gmra.mrb[44].mxu1 %v3463_v8 }
 0x785   : > { %v3472_v50 = vcombine.high %v3471_v0, %v3471_v0  ;;  %v3479_v15 = vrot.slane %v3471_v0, %v5300_v59 }
 0x787   : > { %v3486_v30 = vrot.slane %v3472_v50, %v5300_v59  ;;  %v3487_v16 = vcombine.high %v3479_v15, %v3479_v15  ;;  %v3490_v63 = vunpack.i.h.s16 %v3479_v15  ;;  %v4422_v1 = vpack.i.b16 %v3479_v15, %v3479_v15 }
 0x789   : > { %v3488_v18 = vcombine.high %v3486_v30, %v3486_v30  ;;  %v3492_v34 = vunpack.i.h.s16 %v3486_v30  ;;  %v3494_v48 = vunpack.i.h.s16 %v3487_v16  ;;  %v3498_v4 = vpack.i.b16 %v3490_v63, %v3490_v63 }
 0x78a   : > { %v4423_v51 = vpack.i.b16 %v3486_v30, %v3486_v30  ;;  %v4424_v53 = vpack.i.b16 %v3487_v16, %v3487_v16  ;;  %v3511_v57 = vrot.slane %v4422_v1, %v5309_v56 }
 0x78b   : > { %v3496_v7 = vunpack.i.h.s16 %v3488_v18  ;;  %v3500_v35 = vpack.i.b16 %v3492_v34, %v3492_v34  ;;  %v3502_v9 = vpack.i.b16 %v3494_v48, %v3494_v48  ;;  %v4425_v17 = vpack.i.b16 %v3488_v18, %v3488_v18 }
 0x78c   : > { %v3518_v10 = vrot.slane %v3498_v4, %v5309_v56  ;;  %v3525_v26 = vrot.slane %v4423_v51, %v5309_v56  ;;  %v3539_v11 = vrot.slane %v4424_v53, %v5309_v56  ;;  %v3573_v58 = vsel %vm5975_vm2, %v3511_v57, %v3572_v55 }
 0x78d   : > { %v3504_v45 = vpack.i.b16 %v3496_v7, %v3496_v7  ;;  %v3532_v40 = vrot.slane %v3500_v35, %v5309_v56  ;;  %v3546_v28 = vrot.slane %v3502_v9, %v5309_v56  ;;  %v3553_v42 = vrot.slane %v4425_v17, %v5309_v56  ;;  %3574 = vst [vmem:[%s5035_s7] sm:$0x8] %v3573_v58 }
 0x78e   : > { %v3576_v49 = vsel %vm5975_vm2, %v3518_v10, %v3575_v31  ;;  %v3579_v14 = vsel %vm5975_vm2, %v3525_v26, %v3578_v2  ;;  %v3585_v20 = vsel %vm5975_vm2, %v3539_v11, %v3584_v6 }
 0x78f   : > { %v3560_v22 = vrot.slane %v3504_v45, %v5309_v56  ;;  %3577 = vst [vmem:[%s5035_s7 + $0x4] sm:$0x8] %v3576_v49  ;;  %3580 = vst [vmem:[%s5035_s7 + $0x8] sm:$0x8] %v3579_v14  ;;  %v3582_v23 = vsel %vm5975_vm2, %v3532_v40, %v3581_v62  ;;  %v3588_v24 = vsel %vm5975_vm2, %v3546_v28, %v3587_v13 }
 0x790   : > { %3586 = vst [vmem:[%s5035_s7 + $0x10] sm:$0x8] %v3585_v20  ;;  %v3591_v25 = vsel %vm5975_vm2, %v3553_v42, %v3590_v12  ;;  %3583 = vst [vmem:[%s5035_s7 + $0xc] sm:$0x8] %v3582_v23 }
 0x791   : > { %3589 = vst [vmem:[%s5035_s7 + $0x14] sm:$0x8] %v3588_v24  ;;  %3592 = vst [vmem:[%s5035_s7 + $0x18] sm:$0x8] %v3591_v25  ;;  %v3594_v27 = vsel %vm5975_vm2, %v3560_v22, %v3593_v21 }
 0x792   : > { %3595 = vst [vmem:[%s5035_s7 + $0x1c] sm:$0x8] %v3594_v27 }
 0x794   : > { %v4016_v49 = vld [vmem:[%s5035_s7] sm:$0x8] }
 0x796   : > { %v4019_v23 = vld [vmem:[%s5035_s7 + $0x4] sm:$0x8] }
 0x856   : > { %v3829_v5 = vpop.f32.mrb[44].mxu0  ;;  %v3870_v29 = vpop.f32.mrb[44].mxu1 }
 0x857   : > { %v3877_v32 = vadd.f32 %v3829_v5, %v6193_v46  ;;  %v3879_v41 = vadd.f32 %v3870_v29, %v6194_v19  ;;  %v3831_v33 = vpop.f32.mrb[45].mxu0  ;;  %v3872_v60 = vpop.f32.mrb[45].mxu1  ;;  %v4022_v29 = vld [vmem:[%s5035_s7 + $0x8] sm:$0x8]  ;;  %v4025_v46 = vld [vmem:[%s5035_s7 + $0xc] sm:$0x8] }
 0x858   : > { %v3878_v38 = vadd.f32 %v3831_v33, %v6195_v44  ;;  %v3880_v37 = vadd.f32 %v3872_v60, %v6196_v36  ;;  %v3833_v47 = vpop.f32.mrb[46].mxu0  ;;  %v3874_v39 = vpop.f32.mrb[46].mxu1  ;;  %v4031_v60 = vld [vmem:[%s5035_s7 + $0x14] sm:$0x8]  ;;  %v4034_v44 = vld [vmem:[%s5035_s7 + $0x18] sm:$0x8] }
 0x859   : > { %v4458_v43 = vmul.f32 -1.442695, %v3877_v32  ;;  %v3834_v3 = vpop.f32.mrb[47].mxu0  ;;  %v3875_v61 = vpop.f32.mrb[47].mxu1  ;;  %v4028_v32 = vld [vmem:[%s5035_s7 + $0x10] sm:$0x8] }
 0x85a   : > { %v4459_v8 = vmul.f32 -1.442695, %v3878_v38  ;;  %v4460_v0 = vmul.f32 -1.442695, %v3880_v37 }
 0x85b   : > { %4794 = vpow2.f32 %v4458_v43 }
 0x85c   : > { %4796 = vpow2.f32 %v4459_v8 }
 0x85d   : > { %4798 = vpow2.f32 %v4460_v0 }
 0x85e   : > { %4800 = vtanh.f32 %v3879_v41 }
 0x865   : > { %v4795_v50 = vpop.eup %4794 }
 0x866   : > { %v4797_v15 = vpop.eup %4796  ;;  %v3884_v30 = vadd.f32 1.0, %v4795_v50 }
 0x867   : > { %v3890_v16 = vadd.f32 1.0, %v4797_v15  ;;  %v4799_v63 = vpop.eup %4798 }
 0x868   : > { %4802 = vrcp.f32 %v3884_v30  ;;  %v4801_v1 = vpop.eup %4800  ;;  %v3897_v4 = vadd.f32 1.0, %v4799_v63 }
 0x869   : > { %4804 = vrcp.f32 %v3890_v16 }
 0x86a   : > { %4806 = vrcp.f32 %v3897_v4 }
 0x872   : > { %v4803_v18 = vpop.eup %4802 }
 0x873   : > { %v4805_v34 = vpop.eup %4804  ;;  %v3902_v48 = vmul.f32 %v4803_v18, %v4801_v1 }
 0x874   : > { %v3901_v52 = vmul.f32 %v4805_v34, %v5968_v54  ;;  %v4807_v51 = vpop.eup %4806 }
 0x876   : > { %v3903_v55 = vadd.f32 %v3902_v48, %v3901_v52 }
 0x878   : > { %4808 = vtanh.f32 %v3903_v55  ;;  %3906 = vst [vmem:[#allocation3] sm:$0xff] %v3903_v55 }
 0x882   : > { %v4809_v53 = vpop.eup %4808 }
 0x883   : > { %v3905_v57 = vmul.f32 %v4809_v53, %v4807_v51 }
 0x885   : > { %3907 = vst [vmem:[#allocation2] sm:$0xff] %v3905_v57  ;;  %v3908_v7 = vpack.c.bf16 %v3905_v57, %v3905_v57 }
 0x887   : > { %v3916_v35 = vrot.slane %v3908_v7, %v5300_v59 }
 0x889   : > { %v3917_v9 = vcombine.high %v3916_v35, %v3916_v35  ;;  %v3924_v17 = vrot.slane %v3916_v35, %v5300_v59 }
 0x88b   : > { %v3931_v31 = vrot.slane %v3917_v9, %v5300_v59  ;;  %v3932_v2 = vcombine.high %v3924_v17, %v3924_v17  ;;  %v3935_v54 = vunpack.i.h.s16 %v3924_v17  ;;  %v4461_v6 = vpack.i.b16 %v3924_v17, %v3924_v17 }
 0x88d   : > { %v3933_v10 = vcombine.high %v3931_v31, %v3931_v31  ;;  %v3937_v26 = vunpack.i.h.s16 %v3931_v31  ;;  %v3939_v11 = vunpack.i.h.s16 %v3932_v2  ;;  %v3943_v58 = vpack.i.b16 %v3935_v54, %v3935_v54 }
 0x88e   : > { %v4462_v13 = vpack.i.b16 %v3931_v31, %v3931_v31  ;;  %v4463_v12 = vpack.i.b16 %v3932_v2, %v3932_v2  ;;  %v3956_v59 = vrot.slane %v4461_v6, %v5309_v56 }
 0x88f   : > { %v3941_v45 = vunpack.i.h.s16 %v3933_v10  ;;  %v3945_v40 = vpack.i.b16 %v3937_v26, %v3937_v26  ;;  %v3947_v28 = vpack.i.b16 %v3939_v11, %v3939_v11  ;;  %v4464_v42 = vpack.i.b16 %v3933_v10, %v3933_v10 }
 0x890   : > { %v3963_v14 = vrot.slane %v3943_v58, %v5309_v56  ;;  %v3970_v20 = vrot.slane %v4462_v13, %v5309_v56  ;;  %v3984_v21 = vrot.slane %v4463_v12, %v5309_v56  ;;  %v4017_v22 = vsel %vm6028_vm4, %v3956_v59, %v4016_v49 }
 0x891   : > { %v3949_v24 = vpack.i.b16 %v3941_v45, %v3941_v45  ;;  %v3977_v25 = vrot.slane %v3945_v40, %v5309_v56  ;;  %v3991_v27 = vrot.slane %v3947_v28, %v5309_v56  ;;  %v3998_v5 = vrot.slane %v4464_v42, %v5309_v56  ;;  %4018 = vst [vmem:[%s5035_s7] sm:$0x8] %v4017_v22 }
 0x892   : > { %v4020_v19 = vsel %vm6028_vm4, %v3963_v14, %v4019_v23  ;;  %v4023_v41 = vsel %vm6028_vm4, %v3970_v20, %v4022_v29  ;;  %v4029_v33 = vsel %vm6028_vm4, %v3984_v21, %v4028_v32 }
 0x893   : > { %v4005_v38 = vrot.slane %v3949_v24, %v5309_v56  ;;  %4021 = vst [vmem:[%s5035_s7 + $0x4] sm:$0x8] %v4020_v19  ;;  %4024 = vst [vmem:[%s5035_s7 + $0x8] sm:$0x8] %v4023_v41  ;;  %v4026_v36 = vsel %vm6028_vm4, %v3977_v25, %v4025_v46  ;;  %v4032_v37 = vsel %vm6028_vm4, %v3991_v27, %v4031_v60  ;;  %v4037_v56 = vld [vmem:[%s5035_s7 + $0x1c] sm:$0x8] }
 0x894   : > { %4030 = vst [vmem:[%s5035_s7 + $0x10] sm:$0x8] %v4029_v33  ;;  %v4035_v47 = vsel %vm6028_vm4, %v3998_v5, %v4034_v44  ;;  %4027 = vst [vmem:[%s5035_s7 + $0xc] sm:$0x8] %v4026_v36 }
 0x895   : > { %4033 = vst [vmem:[%s5035_s7 + $0x14] sm:$0x8] %v4032_v37  ;;  %4036 = vst [vmem:[%s5035_s7 + $0x18] sm:$0x8] %v4035_v47  ;;  %v4038_v39 = vsel %vm6028_vm4, %v4005_v38, %v4037_v56 }
 0x896   : > { %4039 = vst [vmem:[%s5035_s7 + $0x1c] sm:$0x8] %v4038_v39 }
 0x897   : > { %4851 = shalt.err (!%p4848_p8)
}
 0x898   : > { %s4852_s23 = scalar_lea.hbm %s6060_s6, 512  ;;  %s4856_s13 = scalar_lea.hbm %s6128_s4, 1024 }
 0x899   : > { %p4853_p12 = scmp.ne.s32.totalorder %s6060_s6, %s4852_s23  ;;  %p4857_p1 = scmp.lt.u32.totalorder %s6060_s6, %s6128_s4 }
 0x89a   : > { %p4858_p5 = scmp.lt.u32.totalorder %s4856_s13, %s4852_s23  ;;  %p4860_p9 = scmp.lt.u32.totalorder %s4852_s23, %s6060_s6 }
 0x89b   : > { %p4854_p0 = pnand %p4853_p12, %p6199_p10 }
 0x89c   : > { %p4859_p6 = por %p4858_p5, %p4857_p1 }
 0x89d   : > { %p4855_p2 = pneg %p4854_p0 }
 0x89e   : > { %p4861_p11 = por %p4860_p9, %p4859_p6 }
 0x8a0   : > { %p4862_p13 = pnand %p4861_p11, %p4855_p2 }
 0x8a2   : > { %4865 = shalt.err (!%p4862_p13)
}
 0x8a3   : > { %s4914_s22 = smov 64   ;;  %s4915_s28 = smov 128  }
 0x8a4   : > { %s4916_s30 = smov 4  }
 0x8a5   : > { %4473 = dma.vmem_to_hbm [thread:$0]  (%p6199_p10), %s6072_s5, 512, %s6060_s6, %s6083_s27, %s4914_s22, %s4915_s28, %s4916_s30  }
 0x8a6 PF: > { %p4485_p3 = scmp.ge.s32.totalorder %s4904_s18, 2  ;;  %s4068_s19 = sand.u32 1, %s4892_s15  }
 0x8a7   : > { %p6200_p4 = scmp.ne.s32.totalorder %s6135_s26, 0  ;;  %s4069_s29 = scalar_lea.sflag [#allocation7], %s4068_s19 }
 0x8a9   : > { %p4480_p7 = pnand %p4485_p3, %p6200_p4 }
 0x8ab   : > { %4887 = dma.done.wait (!%p4480_p7), %s4069_s29, 512  }
 0x8ac   : > { %4889 = vsyncadd (!%p4480_p7), %s4069_s29, 4294966784  ;;  %p15_p8 = scmp.ge.s32.totalorder %s4967_s21, 4   ;;  %s6201_s15 = smov %s4896_s16 }
 0x8ad   : > { %s6202_s16 = smov %s4900_s17  ;;  %s6203_s17 = smov %s4978_s24 }
 0x8ae   : > { %s6204_s18 = smov %s4967_s21  ;;  %17 = sbr.rel (!%p15_p8) target bundleno = 4 (0x4), region = 87 }
 0x8b5   :  { %4074 = vsyncpa [#allocation6], 1 }
 0x8b6   :  { %4076 = vsyncpa [#allocation6 + $0x1], 1 }
 0x8b7   :  { %4077 = vsyncpa [#allocation7], 1 }
 0x8b8   :  { %4079 = vsyncpa [#allocation7 + $0x1], 1 }

</bundles_post_ra>
